<compile_context>
chip_gen: v7x
topology: tpu7x:2x2x1
jax: 0.10.0
libtpu: 0.0.40
codegen_flags: <defaults>
</compile_context>

<pallas_src>
import jax
import jax.numpy as jnp
from jax import lax
from jax.experimental import pallas as pl
from jax.experimental.pallas import tpu as pltpu

LANE = 128  # TPU lane width


def lstm_fc_kernel(maxlen_ref,                    # SMEM (1,) int32 (scalar prefetch)
                   x_ref,                         # [Tc*Bb, E]  bf16, row = t*Bb + b
                   len_ref,                       # [Bb, 1]     int32
                   wih_ref,                       # [E, 4*HP]   bf16 (gate order i,f,o,g)
                   whh_ref,                       # [HP, 4*HP]  bf16
                   b_ref,                         # [1, 4*HP]   f32
                   wfc_ref,                       # [HP, LANE]  f32
                   bfc_ref,                       # [1, LANE]   f32
                   logits_ref, hn_ref, cn_ref,    # outputs: [Bb,LANE], [Bb,HP], [Bb,HP]
                   xp_scr, h_scr, c_scr):         # VMEM scratch
    Bb = len_ref.shape[0]
    Tc = x_ref.shape[0] // Bb
    HP = whh_ref.shape[0]

    t_blk = pl.program_id(1)
    n_tblk = pl.num_programs(1)

    @pl.when(t_blk == 0)
    def _init():                                  # new batch block -> reset carry
        h_scr[...] = jnp.zeros_like(h_scr)
        c_scr[...] = jnp.zeros_like(c_scr)

    lengths = len_ref[...]                        # [Bb, 1] int32 (loaded once)
    bias = b_ref[...]                             # [1, 4*HP] f32 (loaded once)

    # ---- Hoisted input projection: ONE big MXU matmul for the whole chunk ----
    xp_scr[...] = jnp.dot(x_ref[...], wih_ref[...],
                          preferred_element_type=jnp.float32)   # [Tc*Bb, 4*HP] f32

    t0 = t_blk * Tc

    def step(t, carry):
        h, c = carry                              # f32 [Bb, HP]
        row = pl.multiple_of(t * Bb, Bb)
        gates = (xp_scr[pl.ds(row, Bb), :]
                 + jnp.dot(h.astype(whh_ref.dtype), whh_ref[...],
                           preferred_element_type=jnp.float32)
                 + bias)                          # [Bb, 4*HP], order (i, f, o, g)
        sig = jax.nn.sigmoid(gates[:, :3 * HP])   # one EUP pass: i, f, o
        g = jnp.tanh(gates[:, 3 * HP:])           # one EUP pass: g
        i = sig[:, 0 * HP:1 * HP]
        f = sig[:, 1 * HP:2 * HP]
        o = sig[:, 2 * HP:3 * HP]
        c_new = f * c + i * g
        h_new = o * jnp.tanh(c_new)
        # pack_padded_sequence: rows past their length keep a frozen state.
        live = (t0 + t) < lengths                 # [Bb, 1]
        return jnp.where(live, h_new, h), jnp.where(live, c_new, c)

    h, c = lax.fori_loop(0, Tc, step, (h_scr[...], c_scr[...]), unroll=True)
    h_scr[...] = h
    c_scr[...] = c

    @pl.when(t_blk == n_tblk - 1)
    def _finish():
        hn_ref[...] = h
        cn_ref[...] = c
        # pad_packed_sequence zero-pads outputs past each length, so
        # out[:, -1, :] is the final hidden state only for rows whose length
        # equals max(lengths) and zeros otherwise; the Linear head runs on it.
        max_len = maxlen_ref[0]
        y_last = jnp.where(lengths >= max_len, h, jnp.zeros_like(h))
        logits_ref[...] = (jnp.dot(y_last, wfc_ref[...],
                                   preferred_element_type=jnp.float32)
                           + bfc_ref[...])


def init_params(key, nwords, embed_size, hidden_size):
    """Deterministic synthetic parameters in the raw nn.Module layout."""
    ks = jax.random.split(key, 7)
    s = 1.0 / (hidden_size ** 0.5)
    return dict(
        embedding=jax.random.normal(ks[0], (nwords, embed_size), jnp.float32),
        w_ih=jax.random.uniform(ks[1], (4 * hidden_size, embed_size),
                                jnp.float32, -s, s),   # nn.LSTM weight_ih_l0 (i,f,g,o)
        w_hh=jax.random.uniform(ks[2], (4 * hidden_size, hidden_size),
                                jnp.float32, -s, s),   # nn.LSTM weight_hh_l0
        b_ih=jax.random.uniform(ks[3], (4 * hidden_size,), jnp.float32, -s, s),
        b_hh=jax.random.uniform(ks[4], (4 * hidden_size,), jnp.float32, -s, s),
        w_fc=jax.random.uniform(ks[5], (2, hidden_size), jnp.float32, -s, s),
        b_fc=jax.random.uniform(ks[6], (2,), jnp.float32, -s, s),
    )


def pack_params(raw, *, compute_dtype=jnp.bfloat16):
    """Repack raw params into the kernel layout:
       * gate order (i, f, o, g) so sigmoid/tanh each cover one contiguous slab,
       * hidden padded to HP (multiple of 128 lanes; zero padding is numerically inert),
       * classifier head padded to a 128-lane output,
       * W_ih / W_hh cast to bf16 (matmul inputs); biases / head stay f32."""
    H = raw["w_hh"].shape[1]
    E = raw["w_ih"].shape[1]
    HP = -(-H // LANE) * LANE
    order = (0, 1, 3, 2)        # source gate (PyTorch i,f,g,o) for slots (i,f,o,g)

    def pack_w(w, in_dim_pad):
        # w: [4H, K] (PyTorch, output-major) -> transposed/padded [in_dim_pad, 4*HP]
        K = w.shape[1]
        out = jnp.zeros((in_dim_pad, 4 * HP), jnp.float32)
        for slot, src in enumerate(order):
            out = out.at[:K, slot * HP:slot * HP + H].set(
                w[src * H:(src + 1) * H, :].T)
        return out

    b = raw["b_ih"] + raw["b_hh"]
    b_p = jnp.zeros((1, 4 * HP), jnp.float32)
    for slot, src in enumerate(order):
        b_p = b_p.at[0, slot * HP:slot * HP + H].set(b[src * H:(src + 1) * H])

    ncls = raw["w_fc"].shape[0]
    wfc_p = jnp.zeros((HP, LANE), jnp.float32).at[:H, :ncls].set(raw["w_fc"].T)
    bfc_p = jnp.zeros((1, LANE), jnp.float32).at[0, :ncls].set(raw["b_fc"])

    return dict(
        embedding=raw["embedding"],
        wih_t=pack_w(raw["w_ih"], E).astype(compute_dtype),    # [E, 4*HP]
        whh_t=pack_w(raw["w_hh"], HP).astype(compute_dtype),   # [HP, 4*HP]
        b=b_p,                                                 # [1, 4*HP]
        wfc_t=wfc_p,                                           # [HP, LANE]
        bfc=bfc_p,                                             # [1, LANE]
    )


def lstm_binary_classifier(x_ids, lengths, params, *, hidden_size, n_classes=2,
                           t_chunk=8, b_block=8):
    """Forward pass equivalent to LSTMBinaryClassifier.forward (inference).

    Returns (logits[B, n_classes], (h_n[1, B, H], c_n[1, B, H]))."""
    B, T = x_ids.shape
    E = params["embedding"].shape[1]
    HP = params["whh_t"].shape[0]
    G = params["whh_t"].shape[1]                 # 4 * HP
    cdt = params["wih_t"].dtype                  # bf16 compute dtype

    b_block = max(8, -(-b_block // 8) * 8)       # sublane-friendly batch block
    t_chunk = max(1, t_chunk)
    B_pad = -(-B // b_block) * b_block
    T_pad = -(-T // t_chunk) * t_chunk
    nb = B_pad // b_block
    nt = T_pad // t_chunk

    ids_p = jnp.zeros((B_pad, T_pad), jnp.int32).at[:B, :T].set(x_ids.astype(jnp.int32))
    len_p = jnp.zeros((B_pad,), jnp.int32).at[:B].set(lengths.astype(jnp.int32))

    # Gather embeddings directly in (batch-block, time, row-in-block) order so
    # each kernel block is a contiguous 2-D [t_chunk*b_block, E] slab; only the
    # tiny int32 id matrix is permuted — no extra HBM pass over activations.
    ids_arr = (ids_p.reshape(nb, b_block, T_pad)
               .transpose(0, 2, 1)
               .reshape(nb, T_pad * b_block))
    x_arr = params["embedding"][ids_arr].astype(cdt)   # [nb, T_pad*b_block, E] bf16
    # TODO(synk): embedding dropout is identity at inference; not implemented.

    max_len = jnp.max(len_p).reshape(1).astype(jnp.int32)   # SMEM scalar prefetch
    len2d = len_p.reshape(B_pad, 1)

    logits_p, hn_p, cn_p = pl.pallas_call(
        lstm_fc_kernel,
        out_shape=(jax.ShapeDtypeStruct((B_pad, LANE), jnp.float32),
                   jax.ShapeDtypeStruct((B_pad, HP), jnp.float32),
                   jax.ShapeDtypeStruct((B_pad, HP), jnp.float32)),
        grid_spec=pltpu.PrefetchScalarGridSpec(
            num_scalar_prefetch=1,
            grid=(nb, nt),
            in_specs=[
                pl.BlockSpec((None, t_chunk * b_block, E), lambda b, t, ml: (b, t, 0)),
                pl.BlockSpec((b_block, 1), lambda b, t, ml: (b, 0)),
                pl.BlockSpec((E, G), lambda b, t, ml: (0, 0)),
                pl.BlockSpec((HP, G), lambda b, t, ml: (0, 0)),
                pl.BlockSpec((1, G), lambda b, t, ml: (0, 0)),
                pl.BlockSpec((HP, LANE), lambda b, t, ml: (0, 0)),
                pl.BlockSpec((1, LANE), lambda b, t, ml: (0, 0)),
            ],
            out_specs=(
                pl.BlockSpec((b_block, LANE), lambda b, t, ml: (b, 0)),
                pl.BlockSpec((b_block, HP), lambda b, t, ml: (b, 0)),
                pl.BlockSpec((b_block, HP), lambda b, t, ml: (b, 0)),
            ),
            scratch_shapes=[
                pltpu.VMEM((t_chunk * b_block, G), jnp.float32),   # hoisted x @ W_ih
                pltpu.VMEM((b_block, HP), jnp.float32),            # h carry
                pltpu.VMEM((b_block, HP), jnp.float32),            # c carry
            ],
        ),
        compiler_params=pltpu.CompilerParams(
            dimension_semantics=("parallel", "arbitrary"),
            vmem_limit_bytes=32 * 1024 * 1024),   # explicit; portable v5e/v6e/v7x
    )(max_len, x_arr, len2d, params["wih_t"], params["whh_t"], params["b"],
      params["wfc_t"], params["bfc"])

    logits = logits_p[:B, :n_classes]
    h_n = hn_p[:B, :hidden_size][None]
    c_n = cn_p[:B, :hidden_size][None]
    return logits, (h_n, c_n)


def reference(x_ids, lengths, raw, *, compute_dtype=jnp.bfloat16):
    """Pure-JAX reference mirroring the PyTorch semantics (and the kernel's
    bf16-matmul / f32-elementwise precision recipe)."""
    emb = raw["embedding"][x_ids]                   # [B, T, E]
    x = emb.astype(compute_dtype)
    w_ih_t = raw["w_ih"].astype(compute_dtype).T    # [E, 4H]
    w_hh_t = raw["w_hh"].astype(compute_dtype).T    # [H, 4H]
    b = (raw["b_ih"] + raw["b_hh"])[None, :]
    B, T, _ = emb.shape
    H = raw["w_hh"].shape[1]
    h = jnp.zeros((B, H), jnp.float32)
    c = jnp.zeros((B, H), jnp.float32)
    for t in range(T):
        g = (jnp.dot(x[:, t, :], w_ih_t, preferred_element_type=jnp.float32)
             + jnp.dot(h.astype(compute_dtype), w_hh_t,
                       preferred_element_type=jnp.float32) + b)
        i = jax.nn.sigmoid(g[:, 0:H])
        f = jax.nn.sigmoid(g[:, H:2 * H])
        gg = jnp.tanh(g[:, 2 * H:3 * H])
        o = jax.nn.sigmoid(g[:, 3 * H:4 * H])
        c_new = f * c + i * gg
        h_new = o * jnp.tanh(c_new)
        m = (t < lengths)[:, None]
        h = jnp.where(m, h_new, h)
        c = jnp.where(m, c_new, c)
    max_len = jnp.max(lengths)
    y_last = jnp.where((lengths >= max_len)[:, None], h, 0.0)
    logits = y_last @ raw["w_fc"].T + raw["b_fc"][None, :]
    return logits, h, c


if __name__ == "__main__":
    nwords, embed_size, hidden_size = 100, 32, 32
    B, T = 2, 8

    key = jax.random.PRNGKey(0)
    kp, kx = jax.random.split(key)
    raw = init_params(kp, nwords, embed_size, hidden_size)
    params = pack_params(raw)

    x_ids = jax.random.randint(kx, (B, T), 0, nwords, dtype=jnp.int32)
    lengths = jnp.array([T, T - 3], dtype=jnp.int32)   # enforce_sorted=False ok

    fwd = jax.jit(lstm_binary_classifier,
                  static_argnames=("hidden_size", "n_classes", "t_chunk", "b_block"))
    logits, (h_n, c_n) = fwd(x_ids, lengths, params, hidden_size=hidden_size)
    jax.block_until_ready((logits, h_n, c_n))

    ref_logits, ref_h, ref_c = reference(x_ids, lengths, raw)
    assert logits.shape == (B, 2) and h_n.shape == (1, B, hidden_size)
    assert jnp.allclose(logits, ref_logits, rtol=2e-3, atol=2e-3)
    assert jnp.allclose(h_n[0], ref_h, rtol=2e-3, atol=2e-3)
    assert jnp.allclose(c_n[0], ref_c, rtol=2e-3, atol=2e-3)

    print("KERNEL_OK")
</pallas_src>

<mosaic_0001>
module attributes {stable_mosaic.version = 11 : i64} {
  func.func @lstm_fc_kernel(%arg0: i32, %arg1: i32, %arg2: memref<1xi32, #tpu.memory_space<smem>>, %arg3: memref<1x64x32xbf16, #tpu.memory_space<vmem>>, %arg4: memref<8x1xi32, #tpu.memory_space<vmem>>, %arg5: memref<32x512xbf16, #tpu.memory_space<vmem>>, %arg6: memref<128x512xbf16, #tpu.memory_space<vmem>>, %arg7: memref<1x512xf32, #tpu.memory_space<vmem>>, %arg8: memref<128x128xf32, #tpu.memory_space<vmem>>, %arg9: memref<1x128xf32, #tpu.memory_space<vmem>>, %arg10: memref<8x128xf32, #tpu.memory_space<vmem>>, %arg11: memref<8x128xf32, #tpu.memory_space<vmem>>, %arg12: memref<8x128xf32, #tpu.memory_space<vmem>>, %arg13: memref<64x512xf32, #tpu.memory_space<vmem>>, %arg14: memref<8x128xf32, #tpu.memory_space<vmem>>, %arg15: memref<8x128xf32, #tpu.memory_space<vmem>>) attributes {dimension_semantics = [#tpu.dimension_semantics<parallel>, #tpu.dimension_semantics<arbitrary>], iteration_bounds = array<i64: 1, 1>, scalar_prefetch = 1 : i64, scratch_operands = 3 : i64, tpu.core_type = #tpu.core_type<tc>, window_params = [{transform_indices = @transform_0, window_bounds = array<i64: 1, 64, 32>}, {transform_indices = @transform_1, window_bounds = array<i64: 8, 1>}, {pipeline_mode = #tpu.pipeline_mode<synchronous>, transform_indices = @transform_2, window_bounds = array<i64: 32, 512>}, {pipeline_mode = #tpu.pipeline_mode<synchronous>, transform_indices = @transform_3, window_bounds = array<i64: 128, 512>}, {pipeline_mode = #tpu.pipeline_mode<synchronous>, transform_indices = @transform_4, window_bounds = array<i64: 1, 512>}, {pipeline_mode = #tpu.pipeline_mode<synchronous>, transform_indices = @transform_5, window_bounds = array<i64: 128, 128>}, {pipeline_mode = #tpu.pipeline_mode<synchronous>, transform_indices = @transform_6, window_bounds = array<i64: 1, 128>}, {transform_indices = @transform_7, window_bounds = array<i64: 8, 128>}, {transform_indices = @transform_8, window_bounds = array<i64: 8, 128>}, {transform_indices = @transform_9, window_bounds = array<i64: 8, 128>}]} {
    %c0_i32 = arith.constant 0 : i32
    %0 = arith.cmpi eq, %arg1, %c0_i32 : i32
    %1 = arith.extui %0 : i1 to i32
    %c0_i32_0 = arith.constant 0 : i32
    %2 = arith.cmpi ne, %1, %c0_i32_0 : i32
    scf.if %2 {
      %cst_71 = arith.constant 0.000000e+00 : f32
      %298 = vector.broadcast %cst_71 : f32 to vector<8x128xf32>
      %c0_72 = arith.constant 0 : index
      %c0_73 = arith.constant 0 : index
      %299 = vector.load %arg14[%c0_72, %c0_73] : memref<8x128xf32, #tpu.memory_space<vmem>>, vector<8x128xf32>
      tpu.vector_store %arg14[%c0_72, %c0_73], %298 {strides = array<i32>} : memref<8x128xf32, #tpu.memory_space<vmem>>, vector<8x128xf32>,
      %cst_74 = arith.constant 0.000000e+00 : f32
      %300 = vector.broadcast %cst_74 : f32 to vector<8x128xf32>
      %c0_75 = arith.constant 0 : index
      %c0_76 = arith.constant 0 : index
      %301 = vector.load %arg15[%c0_75, %c0_76] : memref<8x128xf32, #tpu.memory_space<vmem>>, vector<8x128xf32>
      tpu.vector_store %arg15[%c0_75, %c0_76], %300 {strides = array<i32>} : memref<8x128xf32, #tpu.memory_space<vmem>>, vector<8x128xf32>,
    } else {
    }
    %c0 = arith.constant 0 : index
    %c0_1 = arith.constant 0 : index
    %3 = vector.load %arg4[%c0, %c0_1] : memref<8x1xi32, #tpu.memory_space<vmem>>, vector<8x1xi32>
    %c0_2 = arith.constant 0 : index
    %c0_3 = arith.constant 0 : index
    %4 = vector.load %arg7[%c0_2, %c0_3] : memref<1x512xf32, #tpu.memory_space<vmem>>, vector<1x512xf32>
    %c0_4 = arith.constant 0 : index
    %c0_5 = arith.constant 0 : index
    %c0_6 = arith.constant 0 : index
    %5 = vector.load %arg3[%c0_4, %c0_5, %c0_6] : memref<1x64x32xbf16, #tpu.memory_space<vmem>>, vector<1x64x32xbf16>
    %6 = vector.shape_cast %5 : vector<1x64x32xbf16> to vector<64x32xbf16>
    %c0_7 = arith.constant 0 : index
    %c0_8 = arith.constant 0 : index
    %7 = vector.load %arg5[%c0_7, %c0_8] : memref<32x512xbf16, #tpu.memory_space<vmem>>, vector<32x512xbf16>
    %cst = arith.constant dense<0.000000e+00> : vector<64x512xf32>
    %8 = tpu.matmul %6, %7, %cst {dimension_numbers = #tpu.dot_dimension_numbers<[1], [0], [0], [1], [0, 0, 1, 1], [], []>} : vector<64x32xbf16>, vector<32x512xbf16>, vector<64x512xf32> -> vector<64x512xf32>
    %c0_9 = arith.constant 0 : index
    %c0_10 = arith.constant 0 : index
    %9 = vector.load %arg13[%c0_9, %c0_10] : memref<64x512xf32, #tpu.memory_space<vmem>>, vector<64x512xf32>
    tpu.vector_store %arg13[%c0_9, %c0_10], %8 {strides = array<i32>} : memref<64x512xf32, #tpu.memory_space<vmem>>, vector<64x512xf32>,
    %c8_i32 = arith.constant 8 : i32
    %10 = arith.muli %arg1, %c8_i32 : i32
    %c0_11 = arith.constant 0 : index
    %c0_12 = arith.constant 0 : index
    %11 = vector.load %arg14[%c0_11, %c0_12] : memref<8x128xf32, #tpu.memory_space<vmem>>, vector<8x128xf32>
    %c0_13 = arith.constant 0 : index
    %c0_14 = arith.constant 0 : index
    %12 = vector.load %arg15[%c0_13, %c0_14] : memref<8x128xf32, #tpu.memory_space<vmem>>, vector<8x128xf32>
    %c0_i32_15 = arith.constant 0 : i32
    %c8_i32_16 = arith.constant 8 : i32
    %13 = arith.muli %c0_i32_15, %c8_i32_16 : i32
    %14 = tpu.assume_multiple %13, 8 : i32
    %15 = arith.index_cast %14 : i32 to index
    %c0_17 = arith.constant 0 : index
    %16 = vector.load %arg13[%15, %c0_17] : memref<64x512xf32, #tpu.memory_space<vmem>>, vector<8x512xf32>
    %17 = arith.truncf %11 : vector<8x128xf32> to vector<8x128xbf16>
    %c0_18 = arith.constant 0 : index
    %c0_19 = arith.constant 0 : index
    %18 = vector.load %arg6[%c0_18, %c0_19] : memref<128x512xbf16, #tpu.memory_space<vmem>>, vector<128x512xbf16>
    %cst_20 = arith.constant dense<0.000000e+00> : vector<8x512xf32>
    %19 = tpu.matmul %17, %18, %cst_20 {dimension_numbers = #tpu.dot_dimension_numbers<[1], [0], [0], [1], [0, 0, 1, 1], [], []>} : vector<8x128xbf16>, vector<128x512xbf16>, vector<8x512xf32> -> vector<8x512xf32>
    %20 = arith.addf %16, %19 : vector<8x512xf32>
    %21 = vector.broadcast %4 : vector<1x512xf32> to vector<8x512xf32>
    %22 = arith.addf %20, %21 : vector<8x512xf32>
    %23 = vector.extract_strided_slice %22 {offsets = [0, 0], sizes = [8, 384], strides = [1, 1]} : vector<8x512xf32> to vector<8x384xf32>
    %24 = arith.negf %23 : vector<8x384xf32>
    %25 = math.exp %24 : vector<8x384xf32>
    %cst_21 = arith.constant 1.000000e+00 : f32
    %26 = vector.broadcast %cst_21 : f32 to vector<8x384xf32>
    %27 = arith.addf %26, %25 : vector<8x384xf32>
    %28 = arith.divf %26, %27 : vector<8x384xf32>
    %29 = vector.extract_strided_slice %22 {offsets = [0, 384], sizes = [8, 128], strides = [1, 1]} : vector<8x512xf32> to vector<8x128xf32>
    %30 = math.tanh %29 : vector<8x128xf32>
    %31 = vector.extract_strided_slice %28 {offsets = [0, 0], sizes = [8, 128], strides = [1, 1]} : vector<8x384xf32> to vector<8x128xf32>
    %32 = vector.extract_strided_slice %28 {offsets = [0, 128], sizes = [8, 128], strides = [1, 1]} : vector<8x384xf32> to vector<8x128xf32>
    %33 = vector.extract_strided_slice %28 {offsets = [0, 256], sizes = [8, 128], strides = [1, 1]} : vector<8x384xf32> to vector<8x128xf32>
    %34 = arith.mulf %32, %12 : vector<8x128xf32>
    %35 = arith.mulf %31, %30 : vector<8x128xf32>
    %36 = arith.addf %34, %35 : vector<8x128xf32>
    %37 = math.tanh %36 : vector<8x128xf32>
    %38 = arith.mulf %33, %37 : vector<8x128xf32>
    %39 = arith.addi %10, %c0_i32_15 : i32
    %40 = vector.broadcast %39 : i32 to vector<8x1xi32>
    %41 = arith.cmpi slt, %40, %3 : vector<8x1xi32>
    %42 = vector.shape_cast %41 : vector<8x1xi1> to vector<8x1xi1>
    %43 = vector.broadcast %42 : vector<8x1xi1> to vector<8x128xi1>
    %44 = arith.select %43, %38, %11 : vector<8x128xi1>, vector<8x128xf32>
    %45 = vector.shape_cast %41 : vector<8x1xi1> to vector<8x1xi1>
    %46 = vector.broadcast %45 : vector<8x1xi1> to vector<8x128xi1>
    %47 = arith.select %46, %36, %12 : vector<8x128xi1>, vector<8x128xf32>
    %c1_i32 = arith.constant 1 : i32
    %c8_i32_22 = arith.constant 8 : i32
    %48 = arith.muli %c1_i32, %c8_i32_22 : i32
    %49 = tpu.assume_multiple %48, 8 : i32
    %50 = arith.index_cast %49 : i32 to index
    %c0_23 = arith.constant 0 : index
    %51 = vector.load %arg13[%50, %c0_23] : memref<64x512xf32, #tpu.memory_space<vmem>>, vector<8x512xf32>
    %52 = arith.truncf %44 : vector<8x128xf32> to vector<8x128xbf16>
    %c0_24 = arith.constant 0 : index
    %c0_25 = arith.constant 0 : index
    %53 = vector.load %arg6[%c0_24, %c0_25] : memref<128x512xbf16, #tpu.memory_space<vmem>>, vector<128x512xbf16>
    %cst_26 = arith.constant dense<0.000000e+00> : vector<8x512xf32>
    %54 = tpu.matmul %52, %53, %cst_26 {dimension_numbers = #tpu.dot_dimension_numbers<[1], [0], [0], [1], [0, 0, 1, 1], [], []>} : vector<8x128xbf16>, vector<128x512xbf16>, vector<8x512xf32> -> vector<8x512xf32>
    %55 = arith.addf %51, %54 : vector<8x512xf32>
    %56 = vector.broadcast %4 : vector<1x512xf32> to vector<8x512xf32>
    %57 = arith.addf %55, %56 : vector<8x512xf32>
    %58 = vector.extract_strided_slice %57 {offsets = [0, 0], sizes = [8, 384], strides = [1, 1]} : vector<8x512xf32> to vector<8x384xf32>
    %59 = arith.negf %58 : vector<8x384xf32>
    %60 = math.exp %59 : vector<8x384xf32>
    %cst_27 = arith.constant 1.000000e+00 : f32
    %61 = vector.broadcast %cst_27 : f32 to vector<8x384xf32>
    %62 = arith.addf %61, %60 : vector<8x384xf32>
    %63 = arith.divf %61, %62 : vector<8x384xf32>
    %64 = vector.extract_strided_slice %57 {offsets = [0, 384], sizes = [8, 128], strides = [1, 1]} : vector<8x512xf32> to vector<8x128xf32>
    %65 = math.tanh %64 : vector<8x128xf32>
    %66 = vector.extract_strided_slice %63 {offsets = [0, 0], sizes = [8, 128], strides = [1, 1]} : vector<8x384xf32> to vector<8x128xf32>
    %67 = vector.extract_strided_slice %63 {offsets = [0, 128], sizes = [8, 128], strides = [1, 1]} : vector<8x384xf32> to vector<8x128xf32>
    %68 = vector.extract_strided_slice %63 {offsets = [0, 256], sizes = [8, 128], strides = [1, 1]} : vector<8x384xf32> to vector<8x128xf32>
    %69 = arith.mulf %67, %47 : vector<8x128xf32>
    %70 = arith.mulf %66, %65 : vector<8x128xf32>
    %71 = arith.addf %69, %70 : vector<8x128xf32>
    %72 = math.tanh %71 : vector<8x128xf32>
    %73 = arith.mulf %68, %72 : vector<8x128xf32>
    %74 = arith.addi %10, %c1_i32 : i32
    %75 = vector.broadcast %74 : i32 to vector<8x1xi32>
    %76 = arith.cmpi slt, %75, %3 : vector<8x1xi32>
    %77 = vector.shape_cast %76 : vector<8x1xi1> to vector<8x1xi1>
    %78 = vector.broadcast %77 : vector<8x1xi1> to vector<8x128xi1>
    %79 = arith.select %78, %73, %44 : vector<8x128xi1>, vector<8x128xf32>
    %80 = vector.shape_cast %76 : vector<8x1xi1> to vector<8x1xi1>
    %81 = vector.broadcast %80 : vector<8x1xi1> to vector<8x128xi1>
    %82 = arith.select %81, %71, %47 : vector<8x128xi1>, vector<8x128xf32>
    %c2_i32 = arith.constant 2 : i32
    %c8_i32_28 = arith.constant 8 : i32
    %83 = arith.muli %c2_i32, %c8_i32_28 : i32
    %84 = tpu.assume_multiple %83, 8 : i32
    %85 = arith.index_cast %84 : i32 to index
    %c0_29 = arith.constant 0 : index
    %86 = vector.load %arg13[%85, %c0_29] : memref<64x512xf32, #tpu.memory_space<vmem>>, vector<8x512xf32>
    %87 = arith.truncf %79 : vector<8x128xf32> to vector<8x128xbf16>
    %c0_30 = arith.constant 0 : index
    %c0_31 = arith.constant 0 : index
    %88 = vector.load %arg6[%c0_30, %c0_31] : memref<128x512xbf16, #tpu.memory_space<vmem>>, vector<128x512xbf16>
    %cst_32 = arith.constant dense<0.000000e+00> : vector<8x512xf32>
    %89 = tpu.matmul %87, %88, %cst_32 {dimension_numbers = #tpu.dot_dimension_numbers<[1], [0], [0], [1], [0, 0, 1, 1], [], []>} : vector<8x128xbf16>, vector<128x512xbf16>, vector<8x512xf32> -> vector<8x512xf32>
    %90 = arith.addf %86, %89 : vector<8x512xf32>
    %91 = vector.broadcast %4 : vector<1x512xf32> to vector<8x512xf32>
    %92 = arith.addf %90, %91 : vector<8x512xf32>
    %93 = vector.extract_strided_slice %92 {offsets = [0, 0], sizes = [8, 384], strides = [1, 1]} : vector<8x512xf32> to vector<8x384xf32>
    %94 = arith.negf %93 : vector<8x384xf32>
    %95 = math.exp %94 : vector<8x384xf32>
    %cst_33 = arith.constant 1.000000e+00 : f32
    %96 = vector.broadcast %cst_33 : f32 to vector<8x384xf32>
    %97 = arith.addf %96, %95 : vector<8x384xf32>
    %98 = arith.divf %96, %97 : vector<8x384xf32>
    %99 = vector.extract_strided_slice %92 {offsets = [0, 384], sizes = [8, 128], strides = [1, 1]} : vector<8x512xf32> to vector<8x128xf32>
    %100 = math.tanh %99 : vector<8x128xf32>
    %101 = vector.extract_strided_slice %98 {offsets = [0, 0], sizes = [8, 128], strides = [1, 1]} : vector<8x384xf32> to vector<8x128xf32>
    %102 = vector.extract_strided_slice %98 {offsets = [0, 128], sizes = [8, 128], strides = [1, 1]} : vector<8x384xf32> to vector<8x128xf32>
    %103 = vector.extract_strided_slice %98 {offsets = [0, 256], sizes = [8, 128], strides = [1, 1]} : vector<8x384xf32> to vector<8x128xf32>
    %104 = arith.mulf %102, %82 : vector<8x128xf32>
    %105 = arith.mulf %101, %100 : vector<8x128xf32>
    %106 = arith.addf %104, %105 : vector<8x128xf32>
    %107 = math.tanh %106 : vector<8x128xf32>
    %108 = arith.mulf %103, %107 : vector<8x128xf32>
    %109 = arith.addi %10, %c2_i32 : i32
    %110 = vector.broadcast %109 : i32 to vector<8x1xi32>
    %111 = arith.cmpi slt, %110, %3 : vector<8x1xi32>
    %112 = vector.shape_cast %111 : vector<8x1xi1> to vector<8x1xi1>
    %113 = vector.broadcast %112 : vector<8x1xi1> to vector<8x128xi1>
    %114 = arith.select %113, %108, %79 : vector<8x128xi1>, vector<8x128xf32>
    %115 = vector.shape_cast %111 : vector<8x1xi1> to vector<8x1xi1>
    %116 = vector.broadcast %115 : vector<8x1xi1> to vector<8x128xi1>
    %117 = arith.select %116, %106, %82 : vector<8x128xi1>, vector<8x128xf32>
    %c3_i32 = arith.constant 3 : i32
    %c8_i32_34 = arith.constant 8 : i32
    %118 = arith.muli %c3_i32, %c8_i32_34 : i32
    %119 = tpu.assume_multiple %118, 8 : i32
    %120 = arith.index_cast %119 : i32 to index
    %c0_35 = arith.constant 0 : index
    %121 = vector.load %arg13[%120, %c0_35] : memref<64x512xf32, #tpu.memory_space<vmem>>, vector<8x512xf32>
    %122 = arith.truncf %114 : vector<8x128xf32> to vector<8x128xbf16>
    %c0_36 = arith.constant 0 : index
    %c0_37 = arith.constant 0 : index
    %123 = vector.load %arg6[%c0_36, %c0_37] : memref<128x512xbf16, #tpu.memory_space<vmem>>, vector<128x512xbf16>
    %cst_38 = arith.constant dense<0.000000e+00> : vector<8x512xf32>
    %124 = tpu.matmul %122, %123, %cst_38 {dimension_numbers = #tpu.dot_dimension_numbers<[1], [0], [0], [1], [0, 0, 1, 1], [], []>} : vector<8x128xbf16>, vector<128x512xbf16>, vector<8x512xf32> -> vector<8x512xf32>
    %125 = arith.addf %121, %124 : vector<8x512xf32>
    %126 = vector.broadcast %4 : vector<1x512xf32> to vector<8x512xf32>
    %127 = arith.addf %125, %126 : vector<8x512xf32>
    %128 = vector.extract_strided_slice %127 {offsets = [0, 0], sizes = [8, 384], strides = [1, 1]} : vector<8x512xf32> to vector<8x384xf32>
    %129 = arith.negf %128 : vector<8x384xf32>
    %130 = math.exp %129 : vector<8x384xf32>
    %cst_39 = arith.constant 1.000000e+00 : f32
    %131 = vector.broadcast %cst_39 : f32 to vector<8x384xf32>
    %132 = arith.addf %131, %130 : vector<8x384xf32>
    %133 = arith.divf %131, %132 : vector<8x384xf32>
    %134 = vector.extract_strided_slice %127 {offsets = [0, 384], sizes = [8, 128], strides = [1, 1]} : vector<8x512xf32> to vector<8x128xf32>
    %135 = math.tanh %134 : vector<8x128xf32>
    %136 = vector.extract_strided_slice %133 {offsets = [0, 0], sizes = [8, 128], strides = [1, 1]} : vector<8x384xf32> to vector<8x128xf32>
    %137 = vector.extract_strided_slice %133 {offsets = [0, 128], sizes = [8, 128], strides = [1, 1]} : vector<8x384xf32> to vector<8x128xf32>
    %138 = vector.extract_strided_slice %133 {offsets = [0, 256], sizes = [8, 128], strides = [1, 1]} : vector<8x384xf32> to vector<8x128xf32>
    %139 = arith.mulf %137, %117 : vector<8x128xf32>
    %140 = arith.mulf %136, %135 : vector<8x128xf32>
    %141 = arith.addf %139, %140 : vector<8x128xf32>
    %142 = math.tanh %141 : vector<8x128xf32>
    %143 = arith.mulf %138, %142 : vector<8x128xf32>
    %144 = arith.addi %10, %c3_i32 : i32
    %145 = vector.broadcast %144 : i32 to vector<8x1xi32>
    %146 = arith.cmpi slt, %145, %3 : vector<8x1xi32>
    %147 = vector.shape_cast %146 : vector<8x1xi1> to vector<8x1xi1>
    %148 = vector.broadcast %147 : vector<8x1xi1> to vector<8x128xi1>
    %149 = arith.select %148, %143, %114 : vector<8x128xi1>, vector<8x128xf32>
    %150 = vector.shape_cast %146 : vector<8x1xi1> to vector<8x1xi1>
    %151 = vector.broadcast %150 : vector<8x1xi1> to vector<8x128xi1>
    %152 = arith.select %151, %141, %117 : vector<8x128xi1>, vector<8x128xf32>
    %c4_i32 = arith.constant 4 : i32
    %c8_i32_40 = arith.constant 8 : i32
    %153 = arith.muli %c4_i32, %c8_i32_40 : i32
    %154 = tpu.assume_multiple %153, 8 : i32
    %155 = arith.index_cast %154 : i32 to index
    %c0_41 = arith.constant 0 : index
    %156 = vector.load %arg13[%155, %c0_41] : memref<64x512xf32, #tpu.memory_space<vmem>>, vector<8x512xf32>
    %157 = arith.truncf %149 : vector<8x128xf32> to vector<8x128xbf16>
    %c0_42 = arith.constant 0 : index
    %c0_43 = arith.constant 0 : index
    %158 = vector.load %arg6[%c0_42, %c0_43] : memref<128x512xbf16, #tpu.memory_space<vmem>>, vector<128x512xbf16>
    %cst_44 = arith.constant dense<0.000000e+00> : vector<8x512xf32>
    %159 = tpu.matmul %157, %158, %cst_44 {dimension_numbers = #tpu.dot_dimension_numbers<[1], [0], [0], [1], [0, 0, 1, 1], [], []>} : vector<8x128xbf16>, vector<128x512xbf16>, vector<8x512xf32> -> vector<8x512xf32>
    %160 = arith.addf %156, %159 : vector<8x512xf32>
    %161 = vector.broadcast %4 : vector<1x512xf32> to vector<8x512xf32>
    %162 = arith.addf %160, %161 : vector<8x512xf32>
    %163 = vector.extract_strided_slice %162 {offsets = [0, 0], sizes = [8, 384], strides = [1, 1]} : vector<8x512xf32> to vector<8x384xf32>
    %164 = arith.negf %163 : vector<8x384xf32>
    %165 = math.exp %164 : vector<8x384xf32>
    %cst_45 = arith.constant 1.000000e+00 : f32
    %166 = vector.broadcast %cst_45 : f32 to vector<8x384xf32>
    %167 = arith.addf %166, %165 : vector<8x384xf32>
    %168 = arith.divf %166, %167 : vector<8x384xf32>
    %169 = vector.extract_strided_slice %162 {offsets = [0, 384], sizes = [8, 128], strides = [1, 1]} : vector<8x512xf32> to vector<8x128xf32>
    %170 = math.tanh %169 : vector<8x128xf32>
    %171 = vector.extract_strided_slice %168 {offsets = [0, 0], sizes = [8, 128], strides = [1, 1]} : vector<8x384xf32> to vector<8x128xf32>
    %172 = vector.extract_strided_slice %168 {offsets = [0, 128], sizes = [8, 128], strides = [1, 1]} : vector<8x384xf32> to vector<8x128xf32>
    %173 = vector.extract_strided_slice %168 {offsets = [0, 256], sizes = [8, 128], strides = [1, 1]} : vector<8x384xf32> to vector<8x128xf32>
    %174 = arith.mulf %172, %152 : vector<8x128xf32>
    %175 = arith.mulf %171, %170 : vector<8x128xf32>
    %176 = arith.addf %174, %175 : vector<8x128xf32>
    %177 = math.tanh %176 : vector<8x128xf32>
    %178 = arith.mulf %173, %177 : vector<8x128xf32>
    %179 = arith.addi %10, %c4_i32 : i32
    %180 = vector.broadcast %179 : i32 to vector<8x1xi32>
    %181 = arith.cmpi slt, %180, %3 : vector<8x1xi32>
    %182 = vector.shape_cast %181 : vector<8x1xi1> to vector<8x1xi1>
    %183 = vector.broadcast %182 : vector<8x1xi1> to vector<8x128xi1>
    %184 = arith.select %183, %178, %149 : vector<8x128xi1>, vector<8x128xf32>
    %185 = vector.shape_cast %181 : vector<8x1xi1> to vector<8x1xi1>
    %186 = vector.broadcast %185 : vector<8x1xi1> to vector<8x128xi1>
    %187 = arith.select %186, %176, %152 : vector<8x128xi1>, vector<8x128xf32>
    %c5_i32 = arith.constant 5 : i32
    %c8_i32_46 = arith.constant 8 : i32
    %188 = arith.muli %c5_i32, %c8_i32_46 : i32
    %189 = tpu.assume_multiple %188, 8 : i32
    %190 = arith.index_cast %189 : i32 to index
    %c0_47 = arith.constant 0 : index
    %191 = vector.load %arg13[%190, %c0_47] : memref<64x512xf32, #tpu.memory_space<vmem>>, vector<8x512xf32>
    %192 = arith.truncf %184 : vector<8x128xf32> to vector<8x128xbf16>
    %c0_48 = arith.constant 0 : index
    %c0_49 = arith.constant 0 : index
    %193 = vector.load %arg6[%c0_48, %c0_49] : memref<128x512xbf16, #tpu.memory_space<vmem>>, vector<128x512xbf16>
    %cst_50 = arith.constant dense<0.000000e+00> : vector<8x512xf32>
    %194 = tpu.matmul %192, %193, %cst_50 {dimension_numbers = #tpu.dot_dimension_numbers<[1], [0], [0], [1], [0, 0, 1, 1], [], []>} : vector<8x128xbf16>, vector<128x512xbf16>, vector<8x512xf32> -> vector<8x512xf32>
    %195 = arith.addf %191, %194 : vector<8x512xf32>
    %196 = vector.broadcast %4 : vector<1x512xf32> to vector<8x512xf32>
    %197 = arith.addf %195, %196 : vector<8x512xf32>
    %198 = vector.extract_strided_slice %197 {offsets = [0, 0], sizes = [8, 384], strides = [1, 1]} : vector<8x512xf32> to vector<8x384xf32>
    %199 = arith.negf %198 : vector<8x384xf32>
    %200 = math.exp %199 : vector<8x384xf32>
    %cst_51 = arith.constant 1.000000e+00 : f32
    %201 = vector.broadcast %cst_51 : f32 to vector<8x384xf32>
    %202 = arith.addf %201, %200 : vector<8x384xf32>
    %203 = arith.divf %201, %202 : vector<8x384xf32>
    %204 = vector.extract_strided_slice %197 {offsets = [0, 384], sizes = [8, 128], strides = [1, 1]} : vector<8x512xf32> to vector<8x128xf32>
    %205 = math.tanh %204 : vector<8x128xf32>
    %206 = vector.extract_strided_slice %203 {offsets = [0, 0], sizes = [8, 128], strides = [1, 1]} : vector<8x384xf32> to vector<8x128xf32>
    %207 = vector.extract_strided_slice %203 {offsets = [0, 128], sizes = [8, 128], strides = [1, 1]} : vector<8x384xf32> to vector<8x128xf32>
    %208 = vector.extract_strided_slice %203 {offsets = [0, 256], sizes = [8, 128], strides = [1, 1]} : vector<8x384xf32> to vector<8x128xf32>
    %209 = arith.mulf %207, %187 : vector<8x128xf32>
    %210 = arith.mulf %206, %205 : vector<8x128xf32>
    %211 = arith.addf %209, %210 : vector<8x128xf32>
    %212 = math.tanh %211 : vector<8x128xf32>
    %213 = arith.mulf %208, %212 : vector<8x128xf32>
    %214 = arith.addi %10, %c5_i32 : i32
    %215 = vector.broadcast %214 : i32 to vector<8x1xi32>
    %216 = arith.cmpi slt, %215, %3 : vector<8x1xi32>
    %217 = vector.shape_cast %216 : vector<8x1xi1> to vector<8x1xi1>
    %218 = vector.broadcast %217 : vector<8x1xi1> to vector<8x128xi1>
    %219 = arith.select %218, %213, %184 : vector<8x128xi1>, vector<8x128xf32>
    %220 = vector.shape_cast %216 : vector<8x1xi1> to vector<8x1xi1>
    %221 = vector.broadcast %220 : vector<8x1xi1> to vector<8x128xi1>
    %222 = arith.select %221, %211, %187 : vector<8x128xi1>, vector<8x128xf32>
    %c6_i32 = arith.constant 6 : i32
    %c8_i32_52 = arith.constant 8 : i32
    %223 = arith.muli %c6_i32, %c8_i32_52 : i32
    %224 = tpu.assume_multiple %223, 8 : i32
    %225 = arith.index_cast %224 : i32 to index
    %c0_53 = arith.constant 0 : index
    %226 = vector.load %arg13[%225, %c0_53] : memref<64x512xf32, #tpu.memory_space<vmem>>, vector<8x512xf32>
    %227 = arith.truncf %219 : vector<8x128xf32> to vector<8x128xbf16>
    %c0_54 = arith.constant 0 : index
    %c0_55 = arith.constant 0 : index
    %228 = vector.load %arg6[%c0_54, %c0_55] : memref<128x512xbf16, #tpu.memory_space<vmem>>, vector<128x512xbf16>
    %cst_56 = arith.constant dense<0.000000e+00> : vector<8x512xf32>
    %229 = tpu.matmul %227, %228, %cst_56 {dimension_numbers = #tpu.dot_dimension_numbers<[1], [0], [0], [1], [0, 0, 1, 1], [], []>} : vector<8x128xbf16>, vector<128x512xbf16>, vector<8x512xf32> -> vector<8x512xf32>
    %230 = arith.addf %226, %229 : vector<8x512xf32>
    %231 = vector.broadcast %4 : vector<1x512xf32> to vector<8x512xf32>
    %232 = arith.addf %230, %231 : vector<8x512xf32>
    %233 = vector.extract_strided_slice %232 {offsets = [0, 0], sizes = [8, 384], strides = [1, 1]} : vector<8x512xf32> to vector<8x384xf32>
    %234 = arith.negf %233 : vector<8x384xf32>
    %235 = math.exp %234 : vector<8x384xf32>
    %cst_57 = arith.constant 1.000000e+00 : f32
    %236 = vector.broadcast %cst_57 : f32 to vector<8x384xf32>
    %237 = arith.addf %236, %235 : vector<8x384xf32>
    %238 = arith.divf %236, %237 : vector<8x384xf32>
    %239 = vector.extract_strided_slice %232 {offsets = [0, 384], sizes = [8, 128], strides = [1, 1]} : vector<8x512xf32> to vector<8x128xf32>
    %240 = math.tanh %239 : vector<8x128xf32>
    %241 = vector.extract_strided_slice %238 {offsets = [0, 0], sizes = [8, 128], strides = [1, 1]} : vector<8x384xf32> to vector<8x128xf32>
    %242 = vector.extract_strided_slice %238 {offsets = [0, 128], sizes = [8, 128], strides = [1, 1]} : vector<8x384xf32> to vector<8x128xf32>
    %243 = vector.extract_strided_slice %238 {offsets = [0, 256], sizes = [8, 128], strides = [1, 1]} : vector<8x384xf32> to vector<8x128xf32>
    %244 = arith.mulf %242, %222 : vector<8x128xf32>
    %245 = arith.mulf %241, %240 : vector<8x128xf32>
    %246 = arith.addf %244, %245 : vector<8x128xf32>
    %247 = math.tanh %246 : vector<8x128xf32>
    %248 = arith.mulf %243, %247 : vector<8x128xf32>
    %249 = arith.addi %10, %c6_i32 : i32
    %250 = vector.broadcast %249 : i32 to vector<8x1xi32>
    %251 = arith.cmpi slt, %250, %3 : vector<8x1xi32>
    %252 = vector.shape_cast %251 : vector<8x1xi1> to vector<8x1xi1>
    %253 = vector.broadcast %252 : vector<8x1xi1> to vector<8x128xi1>
    %254 = arith.select %253, %248, %219 : vector<8x128xi1>, vector<8x128xf32>
    %255 = vector.shape_cast %251 : vector<8x1xi1> to vector<8x1xi1>
    %256 = vector.broadcast %255 : vector<8x1xi1> to vector<8x128xi1>
    %257 = arith.select %256, %246, %222 : vector<8x128xi1>, vector<8x128xf32>
    %c7_i32 = arith.constant 7 : i32
    %c8_i32_58 = arith.constant 8 : i32
    %258 = arith.muli %c7_i32, %c8_i32_58 : i32
    %259 = tpu.assume_multiple %258, 8 : i32
    %260 = arith.index_cast %259 : i32 to index
    %c0_59 = arith.constant 0 : index
    %261 = vector.load %arg13[%260, %c0_59] : memref<64x512xf32, #tpu.memory_space<vmem>>, vector<8x512xf32>
    %262 = arith.truncf %254 : vector<8x128xf32> to vector<8x128xbf16>
    %c0_60 = arith.constant 0 : index
    %c0_61 = arith.constant 0 : index
    %263 = vector.load %arg6[%c0_60, %c0_61] : memref<128x512xbf16, #tpu.memory_space<vmem>>, vector<128x512xbf16>
    %cst_62 = arith.constant dense<0.000000e+00> : vector<8x512xf32>
    %264 = tpu.matmul %262, %263, %cst_62 {dimension_numbers = #tpu.dot_dimension_numbers<[1], [0], [0], [1], [0, 0, 1, 1], [], []>} : vector<8x128xbf16>, vector<128x512xbf16>, vector<8x512xf32> -> vector<8x512xf32>
    %265 = arith.addf %261, %264 : vector<8x512xf32>
    %266 = vector.broadcast %4 : vector<1x512xf32> to vector<8x512xf32>
    %267 = arith.addf %265, %266 : vector<8x512xf32>
    %268 = vector.extract_strided_slice %267 {offsets = [0, 0], sizes = [8, 384], strides = [1, 1]} : vector<8x512xf32> to vector<8x384xf32>
    %269 = arith.negf %268 : vector<8x384xf32>
    %270 = math.exp %269 : vector<8x384xf32>
    %cst_63 = arith.constant 1.000000e+00 : f32
    %271 = vector.broadcast %cst_63 : f32 to vector<8x384xf32>
    %272 = arith.addf %271, %270 : vector<8x384xf32>
    %273 = arith.divf %271, %272 : vector<8x384xf32>
    %274 = vector.extract_strided_slice %267 {offsets = [0, 384], sizes = [8, 128], strides = [1, 1]} : vector<8x512xf32> to vector<8x128xf32>
    %275 = math.tanh %274 : vector<8x128xf32>
    %276 = vector.extract_strided_slice %273 {offsets = [0, 0], sizes = [8, 128], strides = [1, 1]} : vector<8x384xf32> to vector<8x128xf32>
    %277 = vector.extract_strided_slice %273 {offsets = [0, 128], sizes = [8, 128], strides = [1, 1]} : vector<8x384xf32> to vector<8x128xf32>
    %278 = vector.extract_strided_slice %273 {offsets = [0, 256], sizes = [8, 128], strides = [1, 1]} : vector<8x384xf32> to vector<8x128xf32>
    %279 = arith.mulf %277, %257 : vector<8x128xf32>
    %280 = arith.mulf %276, %275 : vector<8x128xf32>
    %281 = arith.addf %279, %280 : vector<8x128xf32>
    %282 = math.tanh %281 : vector<8x128xf32>
    %283 = arith.mulf %278, %282 : vector<8x128xf32>
    %284 = arith.addi %10, %c7_i32 : i32
    %285 = vector.broadcast %284 : i32 to vector<8x1xi32>
    %286 = arith.cmpi slt, %285, %3 : vector<8x1xi32>
    %287 = vector.shape_cast %286 : vector<8x1xi1> to vector<8x1xi1>
    %288 = vector.broadcast %287 : vector<8x1xi1> to vector<8x128xi1>
    %289 = arith.select %288, %283, %254 : vector<8x128xi1>, vector<8x128xf32>
    %290 = vector.shape_cast %286 : vector<8x1xi1> to vector<8x1xi1>
    %291 = vector.broadcast %290 : vector<8x1xi1> to vector<8x128xi1>
    %292 = arith.select %291, %281, %257 : vector<8x128xi1>, vector<8x128xf32>
    %c8_i32_64 = arith.constant 8 : i32
    %c0_65 = arith.constant 0 : index
    %c0_66 = arith.constant 0 : index
    %293 = vector.load %arg14[%c0_65, %c0_66] : memref<8x128xf32, #tpu.memory_space<vmem>>, vector<8x128xf32>
    tpu.vector_store %arg14[%c0_65, %c0_66], %289 {strides = array<i32>} : memref<8x128xf32, #tpu.memory_space<vmem>>, vector<8x128xf32>,
    %c0_67 = arith.constant 0 : index
    %c0_68 = arith.constant 0 : index
    %294 = vector.load %arg15[%c0_67, %c0_68] : memref<8x128xf32, #tpu.memory_space<vmem>>, vector<8x128xf32>
    tpu.vector_store %arg15[%c0_67, %c0_68], %292 {strides = array<i32>} : memref<8x128xf32, #tpu.memory_space<vmem>>, vector<8x128xf32>,
    %c0_i32_69 = arith.constant 0 : i32
    %295 = arith.cmpi eq, %arg1, %c0_i32_69 : i32
    %296 = arith.extui %295 : i1 to i32
    %c0_i32_70 = arith.constant 0 : i32
    %297 = arith.cmpi ne, %296, %c0_i32_70 : i32
    scf.if %297 {
      %c0_71 = arith.constant 0 : index
      %c0_72 = arith.constant 0 : index
      %298 = vector.load %arg11[%c0_71, %c0_72] : memref<8x128xf32, #tpu.memory_space<vmem>>, vector<8x128xf32>
      tpu.vector_store %arg11[%c0_71, %c0_72], %289 {strides = array<i32>} : memref<8x128xf32, #tpu.memory_space<vmem>>, vector<8x128xf32>,
      %c0_73 = arith.constant 0 : index
      %c0_74 = arith.constant 0 : index
      %299 = vector.load %arg12[%c0_73, %c0_74] : memref<8x128xf32, #tpu.memory_space<vmem>>, vector<8x128xf32>
      tpu.vector_store %arg12[%c0_73, %c0_74], %292 {strides = array<i32>} : memref<8x128xf32, #tpu.memory_space<vmem>>, vector<8x128xf32>,
      %c0_75 = arith.constant 0 : index
      %300 = memref.load %arg2[%c0_75] : memref<1xi32, #tpu.memory_space<smem>>
      %301 = vector.broadcast %300 : i32 to vector<8x1xi32>
      %302 = arith.cmpi sge, %3, %301 : vector<8x1xi32>
      %cst_76 = arith.constant 0.000000e+00 : f32
      %303 = vector.broadcast %cst_76 : f32 to vector<8x128xf32>
      %304 = vector.shape_cast %302 : vector<8x1xi1> to vector<8x1xi1>
      %305 = vector.broadcast %304 : vector<8x1xi1> to vector<8x128xi1>
      %306 = arith.select %305, %289, %303 : vector<8x128xi1>, vector<8x128xf32>
      %c0_77 = arith.constant 0 : index
      %c0_78 = arith.constant 0 : index
      %307 = vector.load %arg8[%c0_77, %c0_78] : memref<128x128xf32, #tpu.memory_space<vmem>>, vector<128x128xf32>
      %cst_79 = arith.constant dense<0.000000e+00> : vector<8x128xf32>
      %308 = tpu.matmul %306, %307, %cst_79 {dimension_numbers = #tpu.dot_dimension_numbers<[1], [0], [0], [1], [0, 0, 1, 1], [], []>} : vector<8x128xf32>, vector<128x128xf32>, vector<8x128xf32> -> vector<8x128xf32>
      %c0_80 = arith.constant 0 : index
      %c0_81 = arith.constant 0 : index
      %309 = vector.load %arg9[%c0_80, %c0_81] : memref<1x128xf32, #tpu.memory_space<vmem>>, vector<1x128xf32>
      %310 = vector.broadcast %309 : vector<1x128xf32> to vector<8x128xf32>
      %311 = arith.addf %308, %310 : vector<8x128xf32>
      %c0_82 = arith.constant 0 : index
      %c0_83 = arith.constant 0 : index
      %312 = vector.load %arg10[%c0_82, %c0_83] : memref<8x128xf32, #tpu.memory_space<vmem>>, vector<8x128xf32>
      tpu.vector_store %arg10[%c0_82, %c0_83], %311 {strides = array<i32>} : memref<8x128xf32, #tpu.memory_space<vmem>>, vector<8x128xf32>,
    } else {
    }
    return
  }
  func.func @transform_0(%arg0: i32, %arg1: i32, %arg2: memref<1xi32, #tpu.memory_space<smem>>) -> (i32, i32, i32) {
    %c0_i32 = arith.constant 0 : i32
    %c0_i32_0 = arith.constant 0 : i32
    return %arg0, %arg1, %c0_i32 : i32, i32, i32
  }
  func.func @transform_1(%arg0: i32, %arg1: i32, %arg2: memref<1xi32, #tpu.memory_space<smem>>) -> (i32, i32) {
    %c0_i32 = arith.constant 0 : i32
    %c0_i32_0 = arith.constant 0 : i32
    return %arg0, %c0_i32 : i32, i32
  }
  func.func @transform_2(%arg0: i32, %arg1: i32, %arg2: memref<1xi32, #tpu.memory_space<smem>>) -> (i32, i32) {
    %c0_i32 = arith.constant 0 : i32
    %c0_i32_0 = arith.constant 0 : i32
    %c0_i32_1 = arith.constant 0 : i32
    return %c0_i32, %c0_i32_0 : i32, i32
  }
  func.func @transform_3(%arg0: i32, %arg1: i32, %arg2: memref<1xi32, #tpu.memory_space<smem>>) -> (i32, i32) {
    %c0_i32 = arith.constant 0 : i32
    %c0_i32_0 = arith.constant 0 : i32
    %c0_i32_1 = arith.constant 0 : i32
    return %c0_i32, %c0_i32_0 : i32, i32
  }
  func.func @transform_4(%arg0: i32, %arg1: i32, %arg2: memref<1xi32, #tpu.memory_space<smem>>) -> (i32, i32) {
    %c0_i32 = arith.constant 0 : i32
    %c0_i32_0 = arith.constant 0 : i32
    %c0_i32_1 = arith.constant 0 : i32
    return %c0_i32, %c0_i32_0 : i32, i32
  }
  func.func @transform_5(%arg0: i32, %arg1: i32, %arg2: memref<1xi32, #tpu.memory_space<smem>>) -> (i32, i32) {
    %c0_i32 = arith.constant 0 : i32
    %c0_i32_0 = arith.constant 0 : i32
    %c0_i32_1 = arith.constant 0 : i32
    return %c0_i32, %c0_i32_0 : i32, i32
  }
  func.func @transform_6(%arg0: i32, %arg1: i32, %arg2: memref<1xi32, #tpu.memory_space<smem>>) -> (i32, i32) {
    %c0_i32 = arith.constant 0 : i32
    %c0_i32_0 = arith.constant 0 : i32
    %c0_i32_1 = arith.constant 0 : i32
    return %c0_i32, %c0_i32_0 : i32, i32
  }
  func.func @transform_7(%arg0: i32, %arg1: i32, %arg2: memref<1xi32, #tpu.memory_space<smem>>) -> (i32, i32) {
    %c0_i32 = arith.constant 0 : i32
    %c0_i32_0 = arith.constant 0 : i32
    return %arg0, %c0_i32 : i32, i32
  }
  func.func @transform_8(%arg0: i32, %arg1: i32, %arg2: memref<1xi32, #tpu.memory_space<smem>>) -> (i32, i32) {
    %c0_i32 = arith.constant 0 : i32
    %c0_i32_0 = arith.constant 0 : i32
    return %arg0, %c0_i32 : i32, i32
  }
  func.func @transform_9(%arg0: i32, %arg1: i32, %arg2: memref<1xi32, #tpu.memory_space<smem>>) -> (i32, i32) {
    %c0_i32 = arith.constant 0 : i32
    %c0_i32_0 = arith.constant 0 : i32
    return %arg0, %c0_i32 : i32, i32
  }
}

</mosaic_0001>

<bundles_post_ra>
// kernel: lstm_binary_classifier.1
= control target key start
LH: loop header
LB: loop body
LE: loop exit
PB: predicated region body
PF: predicated region fallthrough
CT: control target
= control target key end

     0   :  { %v3119_v1 = vmov 0   ;;  %vm116_vm0 = vcmask 261120   ;;  %v3117_v49 = vmov 0.0|0.0   ;;  %s3106_s3 = inlined_call_operand.vmem [shape: bf16[32,512], index: 3, kind: input, shape index: {}]   ;;  %s3107_s1 = inlined_call_operand.vmem [shape: bf16[1,64,32], index: 1, kind: input, shape index: {}]   ;;  %s3108_s4 = inlined_call_operand.vmem [shape: bf16[128,512], index: 4, kind: input, shape index: {}]   ;;  %s3109_s2 = inlined_call_operand.vmem [shape: s32[8,1], index: 2, kind: input, shape index: {}]   ;;  %s3110_s0 = inlined_call_operand.<no memory space> [shape: s32[1], index: 0, kind: input, shape index: {}]   ;;  %s3111_s5 = inlined_call_operand.vmem [shape: f32[1,512], index: 5, kind: input, shape index: {}]   ;;  %s3112_s6 = inlined_call_operand.vmem [shape: f32[128,128], index: 6, kind: input, shape index: {}]   ;;  %s3113_s10 = inlined_call_operand.vmem [shape: f32[8,128], index: 10, kind: output, shape index: {2}]   ;;  %s3114_s9 = inlined_call_operand.vmem [shape: f32[8,128], index: 9, kind: output, shape index: {1}]   ;;  %s3115_s7 = inlined_call_operand.vmem [shape: f32[1,128], index: 7, kind: input, shape index: {}]   ;;  %s3116_s8 = inlined_call_operand.vmem [shape: f32[8,128], index: 8, kind: output, shape index: {0}]  }
   0x1   :  { %v1881_v0 = vld [vmem:[%s3106_s3 + $0x4] ss:$16 sps:$4 sm:$0xff]   ;;  %161 = vmatprep.mubr.bf16.mxu0 %v3119_v1  ;;  %234 = vmatprep.mubr.bf16.mxu1 %v3119_v1  ;;  %v1883_v2 = vld [vmem:[%s3106_s3 + $0xc] ss:$16 sps:$4 sm:$0xff]   ;;  %v1885_v3 = vld [vmem:[%s3106_s3] ss:$16 sps:$4 sm:$0xff]   ;;  %v1586_v50 = vstv %s3110_s0 }
   0x2   :  { %1879 = vset.pattern.permute.xlu0 %v3119_v1  ;;  %1880 = vset.pattern.permute.xlu1 %v3119_v1  ;;  %v1886_v4 = vld [vmem:[%s3106_s3 + $0x8] ss:$16 sps:$4 sm:$0xff]   ;;  %v1887_v5 = vld [vmem:[%s3106_s3 + $0x24] ss:$16 sps:$4 sm:$0xff]   ;;  %v1889_v6 = vld [vmem:[%s3106_s3 + $0x2c] ss:$16 sps:$4 sm:$0xff]  }
   0x3   :  { %129 = vmatprep.subr.bf16.mxu0 %v1881_v0  ;;  %202 = vmatprep.subr.bf16.mxu1 %v1883_v2  ;;  %v1891_v7 = vld [vmem:[%s3106_s3 + $0x20] ss:$16 sps:$4 sm:$0xff]   ;;  %v1892_v8 = vld [vmem:[%s3106_s3 + $0x28] ss:$16 sps:$4 sm:$0xff]   ;;  %v2198_v10 = vld [vmem:[%s3108_s4 + $0x4] ss:$16 sps:$4 sm:$0xff]  }
   0x4   :  { %130 = vmatpush1.bf16.msra.mxu0 %v1885_v3  ;;  %203 = vmatpush1.bf16.msra.mxu1 %v1886_v4  ;;  %v1893_v9 = vld [vmem:[%s3107_s1] sm:$0xff]   ;;  %v2203_v11 = vld [vmem:[%s3108_s4 + $0xc] ss:$16 sps:$4 sm:$0xff]   ;;  %v2213_v13 = vld [vmem:[%s3108_s4 + $0x8] ss:$16 sps:$4 sm:$0xff]  }
   0x5   :  { %131 = vmatprep.subr.bf16.mxu0 %v1887_v5  ;;  %204 = vmatprep.subr.bf16.mxu1 %v1889_v6  ;;  %v2208_v12 = vld [vmem:[%s3108_s4] ss:$16 sps:$4 sm:$0xff]   ;;  %v2219_v14 = vld [vmem:[%s3108_s4 + $0x24] ss:$16 sps:$4 sm:$0xff]   ;;  %v2225_v15 = vld [vmem:[%s3108_s4 + $0x2c] ss:$16 sps:$4 sm:$0xff]  }
   0x6   :  { %v2232_v16 = vld [vmem:[%s3108_s4 + $0x20] ss:$16 sps:$4 sm:$0xff]   ;;  %v2239_v17 = vld [vmem:[%s3108_s4 + $0x28] ss:$16 sps:$4 sm:$0xff]   ;;  %v2246_v18 = vld [vmem:[%s3108_s4 + $0x44] ss:$16 sps:$4 sm:$0xff]  }
   0x7   :  { %v1906_v19 = vld [vmem:[%s3107_s1 + $0x8] sm:$0xff]   ;;  %v2261_v21 = vld [vmem:[%s3108_s4 + $0x40] ss:$16 sps:$4 sm:$0xff]   ;;  %v2275_v23 = vld [vmem:[%s3108_s4 + $0x64] ss:$16 sps:$4 sm:$0xff]  }
   0x8   :  { %132 = vmatpush1.bf16.msra.mxu0 %v1891_v7  ;;  %205 = vmatpush1.bf16.msra.mxu1 %v1892_v8  ;;  %v2256_v20 = vld [vmem:[%s3108_s4 + $0x4c] ss:$16 sps:$4 sm:$0xff]   ;;  %v2268_v22 = vld [vmem:[%s3108_s4 + $0x48] ss:$16 sps:$4 sm:$0xff]   ;;  %v2287_v25 = vld [vmem:[%s3108_s4 + $0x60] ss:$16 sps:$4 sm:$0xff]  }
   0x9   :  { %510 = vmatprep.subr.bf16.mxu0 %v2198_v10  ;;  %551 = vmatprep.subr.bf16.mxu1 %v2203_v11  ;;  %v2280_v24 = vld [vmem:[%s3108_s4 + $0x6c] ss:$16 sps:$4 sm:$0xff]   ;;  %v2294_v26 = vld [vmem:[%s3108_s4 + $0x68] ss:$16 sps:$4 sm:$0xff]   ;;  %v2301_v27 = vld [vmem:[%s3108_s4 + $0x84] ss:$16 sps:$4 sm:$0xff]  }
   0xa   :  { %v2306_v28 = vld [vmem:[%s3108_s4 + $0x8c] ss:$16 sps:$4 sm:$0xff]   ;;  %v1919_v29 = vld [vmem:[%s3107_s1 + $0x10] sm:$0xff]   ;;  %v2321_v31 = vld [vmem:[%s3108_s4 + $0x88] ss:$16 sps:$4 sm:$0xff]  }
   0xb   :  { %1719 = vmatmul.mubr.msk.bf16.vlgmr.msra.gmra.mrb[0].mxu0 %vm116_vm0, %v1893_v9  ;;  %1723 = vmatmul.mubr.msk.bf16.vlgmr.msra.gmra.mrb[0].mxu1 %vm116_vm0, %v1893_v9  ;;  %v2316_v30 = vld [vmem:[%s3108_s4 + $0x80] ss:$16 sps:$4 sm:$0xff]   ;;  %v2328_v32 = vld [vmem:[%s3108_s4 + $0xa4] ss:$16 sps:$4 sm:$0xff]   ;;  %v2335_v33 = vld [vmem:[%s3108_s4 + $0xac] ss:$16 sps:$4 sm:$0xff]  }
   0xc   :  { %511 = vmatpush1.bf16.msra.mxu0 %v2208_v12  ;;  %552 = vmatpush1.bf16.msra.mxu1 %v2213_v13  ;;  %v2342_v34 = vld [vmem:[%s3108_s4 + $0xa0] ss:$16 sps:$4 sm:$0xff]   ;;  %v2347_v35 = vld [vmem:[%s3108_s4 + $0xa8] ss:$16 sps:$4 sm:$0xff]   ;;  %v2354_v36 = vld [vmem:[%s3108_s4 + $0xc4] ss:$16 sps:$4 sm:$0xff]  }
   0xd   :  { %512 = vmatprep.subr.bf16.mxu0 %v2219_v14  ;;  %553 = vmatprep.subr.bf16.mxu1 %v2225_v15  ;;  %v2361_v37 = vld [vmem:[%s3108_s4 + $0xcc] ss:$16 sps:$4 sm:$0xff]   ;;  %v2368_v38 = vld [vmem:[%s3109_s2] sm:$0xff]  ;;  %v2384_v41 = vld [vmem:[%s3108_s4 + $0xc8] ss:$16 sps:$4 sm:$0xff]  }
   0xe   :  { %171 = vmatprep.mubr.bf16.mxu0 %v3119_v1  ;;  %244 = vmatprep.mubr.bf16.mxu1 %v3119_v1  ;;  %v1932_v39 = vld [vmem:[%s3107_s1 + $0x18] sm:$0xff]   ;;  %vm1762_vm1 = vcmp.gt.s32.totalorder %v2368_v38, 0  ;;  %v2379_v40 = vld [vmem:[%s3108_s4 + $0xc0] ss:$16 sps:$4 sm:$0xff]   ;;  %v2392_v43 = vld [vmem:[%s3108_s4 + $0xe4] ss:$16 sps:$4 sm:$0xff]   ;;  %vm1587_vm5 = vcmp.ge.s32.totalorder %v2368_v38, %v1586_v50 }
   0xf   :  { %v647_v42 = vsel %vm1762_vm1, 1, %v3119_v1  ;;  %v2397_v44 = vld [vmem:[%s3108_s4 + $0xec] ss:$16 sps:$4 sm:$0xff]   ;;  %vm1766_vm2 = vcmp.gt.s32.totalorder %v2368_v38, 1  ;;  %v2407_v45 = vld [vmem:[%s3108_s4 + $0xe0] ss:$16 sps:$4 sm:$0xff]  }
  0x10   :  { %513 = vmatpush1.bf16.msra.mxu0 %v2232_v16  ;;  %554 = vmatpush1.bf16.msra.mxu1 %v2239_v17  ;;  %v2412_v46 = vld [vmem:[%s3108_s4 + $0xe8] ss:$16 sps:$4 sm:$0xff]   ;;  %v779_v47 = vsel %vm1766_vm2, 1, %v3119_v1  ;;  %vm1778_vm3 = vcmp.gt.s32.totalorder %v2368_v38, 4  ;;  %vm1786_vm4 = vcmp.gt.s32.totalorder %v2368_v38, 6  ;;  %v1588_v52 = vsel %vm1587_vm5, 1, %v3119_v1 }
  0x11   :  { %514 = vmatprep.subr.bf16.mxu0 %v2246_v18  ;;  %555 = vmatprep.subr.bf16.mxu1 %v2256_v20  ;;  %v1175_v48 = vsel %vm1778_vm3, 1, %v3119_v1  ;;  %v1439_v51 = vsel %vm1786_vm4, 1, %v3119_v1  ;;  %vm1770_vm8 = vcmp.gt.s32.totalorder %v2368_v38, 2  ;;  %vm1774_vm9 = vcmp.gt.s32.totalorder %v2368_v38, 3 }
  0x12   :  { %649 = vperm.xlu0 %1879, %v647_v42   ;;  %vm1782_vm10 = vcmp.gt.s32.totalorder %v2368_v38, 5  ;;  %vm1790_vm11 = vcmp.gt.s32.totalorder %v2368_v38, 7  ;;  %vm2107_vm2 = vmmov 0  }
  0x13   :  { %1720 = vmatmul.mubr.msk.bf16.gmra.mrb[4].mxu0 %vm116_vm0, %v1906_v19  ;;  %1724 = vmatmul.mubr.msk.bf16.gmra.mrb[4].mxu1 %vm116_vm0, %v1906_v19 }
  0x14   :  { %515 = vmatpush1.bf16.msra.mxu0 %v2261_v21  ;;  %556 = vmatpush1.bf16.msra.mxu1 %v2268_v22 }
  0x15   :  { %516 = vmatprep.subr.bf16.mxu0 %v2275_v23  ;;  %557 = vmatprep.subr.bf16.mxu1 %v2280_v24 }
  0x16   :  { %181 = vmatprep.mubr.bf16.mxu0 %v3119_v1  ;;  %254 = vmatprep.mubr.bf16.mxu1 %v3119_v1 }
  0x17   :  { %781 = vperm.xlu0 %1879, %v779_v47   ;;  %v597_v47 = vlaneseq }
  0x18   :  { %517 = vmatpush1.bf16.msra.mxu0 %v2287_v25  ;;  %558 = vmatpush1.bf16.msra.mxu1 %v2294_v26 }
  0x19   :  { %518 = vmatprep.subr.bf16.mxu0 %v2301_v27  ;;  %559 = vmatprep.subr.bf16.mxu1 %v2306_v28 }
  0x1b   :  { %1721 = vmatmul.mubr.msk.bf16.gmra.mrb[8].mxu0 %vm116_vm0, %v1919_v29  ;;  %1725 = vmatmul.mubr.msk.bf16.gmra.mrb[8].mxu1 %vm116_vm0, %v1919_v29 }
  0x1c   :  { %519 = vmatpush1.bf16.msra.mxu0 %v2316_v30  ;;  %560 = vmatpush1.bf16.msra.mxu1 %v2321_v31 }
  0x1d   :  { %520 = vmatprep.subr.bf16.mxu0 %v2328_v32  ;;  %561 = vmatprep.subr.bf16.mxu1 %v2335_v33 }
  0x1e   :  { %191 = vmatprep.mubr.bf16.mxu0 %v3119_v1  ;;  %264 = vmatprep.mubr.bf16.mxu1 %v3119_v1 }
  0x1f   :  { %1177 = vperm.xlu0 %1879, %v1175_v48   ;;  %v598_v48 = vshrl.u32 %v597_v47, 7  ;;  %v39_v47 = vld [vmem:[%s3111_s5] sm:$0xf] }
  0x20   :  { %521 = vmatpush1.bf16.msra.mxu0 %v2342_v34  ;;  %562 = vmatpush1.bf16.msra.mxu1 %v2347_v35 }
  0x21   :  { %522 = vmatprep.subr.bf16.mxu0 %v2354_v36  ;;  %563 = vmatprep.subr.bf16.mxu1 %v2361_v37 }
  0x23   :  { %1722 = vmatmul.mubr.msk.bf16.gmra.mrb[12].mxu0 %vm116_vm0, %v1932_v39  ;;  %1726 = vmatmul.mubr.msk.bf16.gmra.mrb[12].mxu1 %vm116_vm0, %v1932_v39 }
  0x24   :  { %523 = vmatpush1.bf16.msra.mxu0 %v2379_v40  ;;  %564 = vmatpush1.bf16.msra.mxu1 %v2384_v41 }
  0x25   :  { %524 = vmatprep.subr.bf16.mxu0 %v2392_v43  ;;  %565 = vmatprep.subr.bf16.mxu1 %v2397_v44 }
  0x26   :  { %542 = vmatprep.mubr.bf16.mxu0 %v3119_v1  ;;  %583 = vmatprep.mubr.bf16.mxu1 %v3119_v1 }
  0x27   :  { %1441 = vperm.xlu0 %1879, %v1439_v51  }
  0x28   :  { %525 = vmatpush1.bf16.msra.mxu0 %v2407_v45  ;;  %566 = vmatpush1.bf16.msra.mxu1 %v2412_v46 }
  0x29   :  { %662 = vmatprep.subr.bf16.mxu0 %v2198_v10  ;;  %703 = vmatprep.subr.bf16.mxu1 %v2203_v11 }
  0x2b   :  { %543 = vmatmul.mubr.bf16.vlgmr.msra.gmra.mrb[16].mxu0 %v3117_v49  ;;  %584 = vmatmul.mubr.bf16.vlgmr.msra.gmra.mrb[16].mxu1 %v3117_v49 }
  0x2c   :  { %663 = vmatpush1.bf16.msra.mxu0 %v2208_v12  ;;  %704 = vmatpush1.bf16.msra.mxu1 %v2213_v13 }
  0x2d   :  { %664 = vmatprep.subr.bf16.mxu0 %v2219_v14  ;;  %705 = vmatprep.subr.bf16.mxu1 %v2225_v15 }
  0x2e   :  { %694 = vmatprep.mubr.bf16.mxu0 %v3119_v1  ;;  %735 = vmatprep.mubr.bf16.mxu1 %v3119_v1 }
  0x2f   :  { %1590 = vperm.xlu0 %1879, %v1588_v52  }
  0x30   :  { %665 = vmatpush1.bf16.msra.mxu0 %v2232_v16  ;;  %706 = vmatpush1.bf16.msra.mxu1 %v2239_v17 }
  0x31   :  { %666 = vmatprep.subr.bf16.mxu0 %v2246_v18  ;;  %707 = vmatprep.subr.bf16.mxu1 %v2256_v20 }
  0x34   :  { %667 = vmatpush1.bf16.msra.mxu0 %v2261_v21  ;;  %708 = vmatpush1.bf16.msra.mxu1 %v2268_v22 }
  0x35   :  { %668 = vmatprep.subr.bf16.mxu0 %v2275_v23  ;;  %709 = vmatprep.subr.bf16.mxu1 %v2280_v24 }
  0x38   :  { %669 = vmatpush1.bf16.msra.mxu0 %v2287_v25  ;;  %710 = vmatpush1.bf16.msra.mxu1 %v2294_v26 }
  0x39   :  { %670 = vmatprep.subr.bf16.mxu0 %v2301_v27  ;;  %711 = vmatprep.subr.bf16.mxu1 %v2306_v28 }
  0x3c   :  { %671 = vmatpush1.bf16.msra.mxu0 %v2316_v30  ;;  %712 = vmatpush1.bf16.msra.mxu1 %v2321_v31 }
  0x3d   :  { %672 = vmatprep.subr.bf16.mxu0 %v2328_v32  ;;  %713 = vmatprep.subr.bf16.mxu1 %v2335_v33 }
  0x40   :  { %673 = vmatpush1.bf16.msra.mxu0 %v2342_v34  ;;  %714 = vmatpush1.bf16.msra.mxu1 %v2347_v35 }
  0x41   :  { %674 = vmatprep.subr.bf16.mxu0 %v2354_v36  ;;  %715 = vmatprep.subr.bf16.mxu1 %v2361_v37 }
  0x44   :  { %675 = vmatpush1.bf16.msra.mxu0 %v2379_v40  ;;  %716 = vmatpush1.bf16.msra.mxu1 %v2384_v41 }
  0x45   :  { %676 = vmatprep.subr.bf16.mxu0 %v2392_v43  ;;  %717 = vmatprep.subr.bf16.mxu1 %v2397_v44 }
  0x48   :  { %677 = vmatpush1.bf16.msra.mxu0 %v2407_v45  ;;  %718 = vmatpush1.bf16.msra.mxu1 %v2412_v46 }
  0x49   :  { %794 = vmatprep.subr.bf16.mxu0 %v2198_v10  ;;  %835 = vmatprep.subr.bf16.mxu1 %v2203_v11 }
  0xde   :  { %v163_v53 = vpop.f32.mrb[0].mxu0  ;;  %v236_v54 = vpop.f32.mrb[0].mxu1 }
  0xdf   :  { %v165_v55 = vpop.f32.mrb[1].mxu0  ;;  %v238_v56 = vpop.f32.mrb[1].mxu1 }
  0xe0   :  { %v2468_v57 = vpop.f32.mrb[2].mxu0  ;;  %v2470_v58 = vpop.f32.mrb[2].mxu1 }
  0xe1   :  { %v2472_v59 = vpop.f32.mrb[3].mxu0  ;;  %v2474_v60 = vpop.f32.mrb[3].mxu1 }
  0xe6   :  { %v2476_v61 = vpop.f32.mrb[4].mxu0  ;;  %v2478_v62 = vpop.f32.mrb[4].mxu1 }
  0xe7   :  { %3121 = vst [vmem:[#allocation7_spill] sm:$0xff] %v2476_v61  ;;  %3122 = vst [vmem:[#allocation8_spill] sm:$0xff] %v2478_v62  ;;  %v2480_v63 = vpop.f32.mrb[5].mxu0  ;;  %v2482_v0 = vpop.f32.mrb[5].mxu1  ;;  %v611_v61 = vsub.s32 3, %v598_v48 }
  0xe8   :  { %3123 = vst [vmem:[#allocation9_spill] sm:$0xff] %v2480_v63  ;;  %3124 = vst [vmem:[#allocation10_spill] sm:$0xff] %v2482_v0  ;;  %v2484_v2 = vpop.f32.mrb[6].mxu0  ;;  %v2486_v3 = vpop.f32.mrb[6].mxu1 }
  0xe9   :  { %3125 = vst [vmem:[#allocation11_spill] sm:$0xff] %v2484_v2  ;;  %3126 = vst [vmem:[#allocation12_spill] sm:$0xff] %v2486_v3  ;;  %v2488_v4 = vpop.f32.mrb[7].mxu0  ;;  %v2490_v5 = vpop.f32.mrb[7].mxu1  ;;  %v607_v3 = vsub.s32 2, %v598_v48 }
  0xea   :  { %3127 = vst [vmem:[#allocation13_spill] sm:$0xff] %v2488_v4  ;;  %3128 = vst [vmem:[#allocation14_spill] sm:$0xff] %v2490_v5 }
  0xee   :  { %v2492_v6 = vpop.f32.mrb[8].mxu0  ;;  %v2494_v7 = vpop.f32.mrb[8].mxu1 }
  0xef   :  { %3129 = vst [vmem:[#allocation15_spill] sm:$0xff] %v2492_v6  ;;  %3130 = vst [vmem:[#allocation16_spill] sm:$0xff] %v2494_v7  ;;  %v2496_v8 = vpop.f32.mrb[9].mxu0  ;;  %v2498_v9 = vpop.f32.mrb[9].mxu1 }
  0xf0   :  { %3131 = vst [vmem:[#allocation17_spill] sm:$0xff] %v2496_v8  ;;  %3132 = vst [vmem:[#allocation18_spill] sm:$0xff] %v2498_v9  ;;  %v2500_v19 = vpop.f32.mrb[10].mxu0  ;;  %v2502_v29 = vpop.f32.mrb[10].mxu1 }
  0xf1   :  { %3133 = vst [vmem:[#allocation19_spill] sm:$0xff] %v2500_v19  ;;  %3134 = vst [vmem:[#allocation20_spill] sm:$0xff] %v2502_v29  ;;  %v2504_v39 = vpop.f32.mrb[11].mxu0  ;;  %v2506_v42 = vpop.f32.mrb[11].mxu1 }
  0xf2   :  { %3135 = vst [vmem:[#allocation21_spill] sm:$0xff] %v2504_v39  ;;  %3136 = vst [vmem:[#allocation22_spill] sm:$0xff] %v2506_v42  ;;  %v599_v39 = vsub.s32 0, %v598_v48 }
  0xf4   :  { %v2527_v42 = vrot.slane %v39_v47, %v599_v39 }
  0xf6   :  { %v2508_v50 = vpop.f32.mrb[12].mxu0  ;;  %v2510_v51 = vpop.f32.mrb[12].mxu1 }
  0xf7   :  { %3137 = vst [vmem:[#allocation23_spill] sm:$0xff] %v2508_v50  ;;  %3138 = vst [vmem:[#allocation24_spill] sm:$0xff] %v2510_v51  ;;  %v2512_v52 = vpop.f32.mrb[13].mxu0  ;;  %v2514_v49 = vpop.f32.mrb[13].mxu1  ;;  %v603_v50 = vsub.s32 1, %v598_v48 }
  0xf8   :  { %3139 = vst [vmem:[#allocation25_spill] sm:$0xff] %v2512_v52  ;;  %3140 = vst [vmem:[#allocation26_spill] sm:$0xff] %v2514_v49  ;;  %v2516_v1 = vpop.f32.mrb[14].mxu0  ;;  %v2518_v9 = vpop.f32.mrb[14].mxu1 }
  0xf9   :  { %3141 = vst [vmem:[#allocation27_spill] sm:$0xff] %v2516_v1  ;;  %3142 = vst [vmem:[#allocation28_spill] sm:$0xff] %v2518_v9  ;;  %v2520_v19 = vpop.f32.mrb[15].mxu0  ;;  %v2522_v29 = vpop.f32.mrb[15].mxu1  ;;  %v2529_v8 = vrot.slane %v39_v47, %v603_v50  ;;  %v2533_v50 = vrot.slane %v39_v47, %v607_v3 }
  0xfa   :  { %3143 = vst [vmem:[#allocation29_spill] sm:$0xff] %v2520_v19  ;;  %3144 = vst [vmem:[#allocation30_spill] sm:$0xff] %v2522_v29 }
  0xfe   :  { %v544_v51 = vpop.f32.mrb[16].mxu0  ;;  %v585_v52 = vpop.f32.mrb[16].mxu1 }
  0xff   :  { %v592_v49 = vadd.f32 %v544_v51, %v163_v53  ;;  %v594_v1 = vadd.f32 %v585_v52, %v236_v54  ;;  %v546_v7 = vpop.f32.mrb[17].mxu0  ;;  %v587_v9 = vpop.f32.mrb[17].mxu1  ;;  %v2535_v53 = vrot.slane %v39_v47, %v611_v61  ;;  %v3145_v52 = vmov 0  }
 0x100   :  { %v593_v6 = vadd.f32 %v546_v7, %v165_v55  ;;  %v595_v19 = vadd.f32 %v587_v9, %v238_v56  ;;  %v548_v5 = vpop.f32.mrb[18].mxu0  ;;  %v589_v29 = vpop.f32.mrb[18].mxu1  ;;  %v911_v47 = vsel %vm1770_vm8, 1, %v3145_v52 }
 0x101   :  { %v617_v4 = vadd.f32 %v2527_v42, %v592_v49  ;;  %v549_v2 = vpop.f32.mrb[19].mxu0  ;;  %v590_v0 = vpop.f32.mrb[19].mxu1  ;;  %v619_v54 = vadd.f32 %v2533_v50, %v594_v1  ;;  %913 = vperm.xlu1 %1880, %v911_v47  }
 0x102   :  { %v618_v39 = vadd.f32 %v2529_v8, %v593_v6  ;;  %v620_v55 = vadd.f32 %v2535_v53, %v595_v19  ;;  %v2542_v29 = vpop.permute.xlu0 %649 }
 0x103   :  { %v1759_v63 = vmul.f32 -1.442695, %v617_v4  ;;  %v1761_v56 = vmul.f32 -1.442695, %v619_v54  ;;  %vm651_vm6 = vcmp.eq.s32.totalorder %v2542_v29, 1  ;;  %v1307_v54 = vsel %vm1782_vm10, 1, %v3145_v52 }
 0x104   :  { %v1760_v62 = vmul.f32 -1.442695, %v618_v39  ;;  %vm1793_vm7 = vmpackc.low %vm651_vm6, %vm651_vm6  ;;  %v1043_v39 = vsel %vm1774_vm9, 1, %v3145_v52 }
 0x105   :  { %1945 = vpow2.f32 %v1759_v63  ;;  %1045 = vperm.xlu1 %1880, %v1043_v39  }
 0x106   :  { %1947 = vpow2.f32 %v1760_v62 }
 0x107   :  { %1949 = vtanh.f32 %v620_v55  ;;  %v1571_v55 = vsel %vm1790_vm11, 1, %v3145_v52 }
 0x108   :  { %1951 = vpow2.f32 %v1761_v56 }
 0x109   :  { %1309 = vperm.xlu1 %1880, %v1307_v54  }
 0x10d   :  { %1573 = vperm.xlu1 %1880, %v1571_v55  }
 0x10f   :  { %v1946_v49 = vpop.eup %1945 }
 0x110   :  { %v630_v5 = vadd.f32 1.0, %v1946_v49  ;;  %v1948_v0 = vpop.eup %1947 }
 0x111   :  { %v631_v2 = vadd.f32 1.0, %v1948_v0  ;;  %v1950_v4 = vpop.eup %1949 }
 0x112   :  { %1953 = vrcp.f32 %v630_v5  ;;  %v1952_v63 = vpop.eup %1951 }
 0x113   :  { %1955 = vrcp.f32 %v631_v2  ;;  %v632_v61 = vadd.f32 1.0, %v1952_v63 }
 0x115   :  { %1957 = vrcp.f32 %v632_v61 }
 0x11c   :  { %v1954_v3 = vpop.eup %1953 }
 0x11d   :  { %v641_v6 = vmul.f32 %v1954_v3, %v1950_v4  ;;  %v1956_v62 = vpop.eup %1955 }
 0x11e   :  { %v640_v7 = vmul.f32 0.0, %v1956_v62 }
 0x11f   :  { %v1958_v1 = vpop.eup %1957 }
 0x120   :  { %v2539_v9 = vadd.f32 %v641_v6, %v640_v7 }
 0x122   :  { %1959 = vtanh.f32 %v2539_v9 }
 0x12c   :  { %v1960_v19 = vpop.eup %1959 }
 0x12d   :  { %v2544_v48 = vmul.f32 %v1960_v19, %v1958_v1 }
 0x12f   :  { %v1794_v51 = vpack.c.bf16 %v2544_v48, %v2544_v48 }
 0x131   :  { %1795 = vmatmul.mubr.msk.bf16.vlgmr.msra.gmra.mrb[20].mxu0 %vm1793_vm7, %v1794_v51  ;;  %1798 = vmatmul.mubr.msk.bf16.vlgmr.msra.gmra.mrb[20].mxu1 %vm1793_vm7, %v1794_v51 }
 0x132   :  { %795 = vmatpush1.bf16.msra.mxu0 %v2208_v12  ;;  %836 = vmatpush1.bf16.msra.mxu1 %v2213_v13 }
 0x133   :  { %796 = vmatprep.subr.bf16.mxu0 %v2219_v14  ;;  %837 = vmatprep.subr.bf16.mxu1 %v2225_v15 }
 0x134   :  { %826 = vmatprep.mubr.bf16.mxu0 %v3145_v52  ;;  %867 = vmatprep.mubr.bf16.mxu1 %v3145_v52 }
 0x136   :  { %797 = vmatpush1.bf16.msra.mxu0 %v2232_v16  ;;  %838 = vmatpush1.bf16.msra.mxu1 %v2239_v17 }
 0x137   :  { %798 = vmatprep.subr.bf16.mxu0 %v2246_v18  ;;  %839 = vmatprep.subr.bf16.mxu1 %v2256_v20 }
 0x13a   :  { %799 = vmatpush1.bf16.msra.mxu0 %v2261_v21  ;;  %840 = vmatpush1.bf16.msra.mxu1 %v2268_v22 }
 0x13b   :  { %800 = vmatprep.subr.bf16.mxu0 %v2275_v23  ;;  %841 = vmatprep.subr.bf16.mxu1 %v2280_v24 }
 0x13e   :  { %801 = vmatpush1.bf16.msra.mxu0 %v2287_v25  ;;  %842 = vmatpush1.bf16.msra.mxu1 %v2294_v26 }
 0x13f   :  { %802 = vmatprep.subr.bf16.mxu0 %v2301_v27  ;;  %843 = vmatprep.subr.bf16.mxu1 %v2306_v28 }
 0x142   :  { %803 = vmatpush1.bf16.msra.mxu0 %v2316_v30  ;;  %844 = vmatpush1.bf16.msra.mxu1 %v2321_v31 }
 0x143   :  { %804 = vmatprep.subr.bf16.mxu0 %v2328_v32  ;;  %845 = vmatprep.subr.bf16.mxu1 %v2335_v33 }
 0x146   :  { %805 = vmatpush1.bf16.msra.mxu0 %v2342_v34  ;;  %846 = vmatpush1.bf16.msra.mxu1 %v2347_v35 }
 0x147   :  { %806 = vmatprep.subr.bf16.mxu0 %v2354_v36  ;;  %847 = vmatprep.subr.bf16.mxu1 %v2361_v37 }
 0x14a   :  { %807 = vmatpush1.bf16.msra.mxu0 %v2379_v40  ;;  %848 = vmatpush1.bf16.msra.mxu1 %v2384_v41 }
 0x14b   :  { %808 = vmatprep.subr.bf16.mxu0 %v2392_v43  ;;  %849 = vmatprep.subr.bf16.mxu1 %v2397_v44 }
 0x14e   :  { %809 = vmatpush1.bf16.msra.mxu0 %v2407_v45  ;;  %850 = vmatpush1.bf16.msra.mxu1 %v2412_v46 }
 0x14f   :  { %926 = vmatprep.subr.bf16.mxu0 %v2198_v10  ;;  %967 = vmatprep.subr.bf16.mxu1 %v2203_v11 }
 0x204   :  { %v696_v56 = vpop.f32.mrb[20].mxu0  ;;  %v737_v49 = vpop.f32.mrb[20].mxu1 }
 0x205   :  { %v744_v5 = vadd.f32 %v696_v56, %v2468_v57  ;;  %v746_v0 = vadd.f32 %v737_v49, %v2470_v58  ;;  %v698_v2 = vpop.f32.mrb[21].mxu0  ;;  %v739_v4 = vpop.f32.mrb[21].mxu1 }
 0x206   :  { %v745_v63 = vadd.f32 %v698_v2, %v2472_v59  ;;  %v747_v3 = vadd.f32 %v739_v4, %v2474_v60  ;;  %v700_v6 = vpop.f32.mrb[22].mxu0  ;;  %v741_v62 = vpop.f32.mrb[22].mxu1 }
 0x207   :  { %v748_v38 = vadd.f32 %v744_v5, %v2527_v42  ;;  %v701_v61 = vpop.f32.mrb[23].mxu0  ;;  %v742_v7 = vpop.f32.mrb[23].mxu1  ;;  %v750_v57 = vadd.f32 %v746_v0, %v2533_v50  ;;  %v653_v0 = vsel %vm651_vm6, %v2539_v9, 0.0 }
 0x208   :  { %v749_v1 = vadd.f32 %v745_v63, %v2529_v8  ;;  %v751_v58 = vadd.f32 %v747_v3, %v2535_v53  ;;  %v782_v3 = vpop.permute.xlu0 %781 }
 0x209   :  { %v1763_v19 = vmul.f32 -1.442695, %v748_v38  ;;  %v1765_v47 = vmul.f32 -1.442695, %v750_v57  ;;  %vm783_vm12 = vcmp.eq.s32.totalorder %v782_v3, 1 }
 0x20a   :  { %v1764_v51 = vmul.f32 -1.442695, %v749_v1  ;;  %v652_v1 = vsel %vm651_vm6, %v2544_v48, 0.0 }
 0x20b   :  { %1961 = vpow2.f32 %v1763_v19 }
 0x20c   :  { %1963 = vpow2.f32 %v1764_v51  ;;  %v3146_v51 = vld [vmem:[#allocation7_spill] sm:$0xff] }
 0x20d   :  { %1965 = vtanh.f32 %v751_v58  ;;  %v3147_v58 = vld [vmem:[#allocation8_spill] sm:$0xff] }
 0x20e   :  { %1967 = vpow2.f32 %v1765_v47 }
 0x215   :  { %v1962_v59 = vpop.eup %1961 }
 0x216   :  { %v761_v39 = vadd.f32 1.0, %v1962_v59  ;;  %v1964_v60 = vpop.eup %1963 }
 0x217   :  { %v762_v54 = vadd.f32 1.0, %v1964_v60  ;;  %v1966_v55 = vpop.eup %1965  ;;  %v3148_v60 = vld [vmem:[#allocation9_spill] sm:$0xff] }
 0x218   :  { %1969 = vrcp.f32 %v761_v39  ;;  %v1968_v56 = vpop.eup %1967 }
 0x219   :  { %1971 = vrcp.f32 %v762_v54  ;;  %v763_v4 = vadd.f32 1.0, %v1968_v56 }
 0x21b   :  { %1973 = vrcp.f32 %v763_v4 }
 0x222   :  { %v1970_v49 = vpop.eup %1969 }
 0x223   :  { %v772_v5 = vmul.f32 %v1970_v49, %v1966_v55  ;;  %v1972_v2 = vpop.eup %1971  ;;  %v3149_v55 = vld [vmem:[#allocation10_spill] sm:$0xff] }
 0x224   :  { %v771_v63 = vmul.f32 %v1972_v2, %v653_v0 }
 0x225   :  { %v1974_v38 = vpop.eup %1973 }
 0x226   :  { %v773_v6 = vadd.f32 %v772_v5, %v771_v63 }
 0x228   :  { %1975 = vtanh.f32 %v773_v6  ;;  %v2605_v62 = vsel %vm783_vm12, %v773_v6, %v653_v0 }
 0x232   :  { %v1976_v61 = vpop.eup %1975 }
 0x233   :  { %v775_v7 = vmul.f32 %v1976_v61, %v1974_v38 }
 0x235   :  { %v2610_v19 = vsel %vm783_vm12, %v775_v7, %v652_v1 }
 0x236   :  { %v793_v9 = vpack.c.bf16 %v2610_v19, %v2610_v19 }
 0x238   :  { %827 = vmatmul.mubr.bf16.vlgmr.msra.gmra.mrb[24].mxu0 %v793_v9  ;;  %868 = vmatmul.mubr.bf16.vlgmr.msra.gmra.mrb[24].mxu1 %v793_v9 }
 0x239   :  { %927 = vmatpush1.bf16.msra.mxu0 %v2208_v12  ;;  %968 = vmatpush1.bf16.msra.mxu1 %v2213_v13 }
 0x23a   :  { %928 = vmatprep.subr.bf16.mxu0 %v2219_v14  ;;  %969 = vmatprep.subr.bf16.mxu1 %v2225_v15 }
 0x23b   :  { %958 = vmatprep.mubr.bf16.mxu0 %v3145_v52  ;;  %999 = vmatprep.mubr.bf16.mxu1 %v3145_v52 }
 0x23d   :  { %929 = vmatpush1.bf16.msra.mxu0 %v2232_v16  ;;  %970 = vmatpush1.bf16.msra.mxu1 %v2239_v17 }
 0x23e   :  { %930 = vmatprep.subr.bf16.mxu0 %v2246_v18  ;;  %971 = vmatprep.subr.bf16.mxu1 %v2256_v20 }
 0x241   :  { %931 = vmatpush1.bf16.msra.mxu0 %v2261_v21  ;;  %972 = vmatpush1.bf16.msra.mxu1 %v2268_v22 }
 0x242   :  { %932 = vmatprep.subr.bf16.mxu0 %v2275_v23  ;;  %973 = vmatprep.subr.bf16.mxu1 %v2280_v24 }
 0x245   :  { %933 = vmatpush1.bf16.msra.mxu0 %v2287_v25  ;;  %974 = vmatpush1.bf16.msra.mxu1 %v2294_v26 }
 0x246   :  { %934 = vmatprep.subr.bf16.mxu0 %v2301_v27  ;;  %975 = vmatprep.subr.bf16.mxu1 %v2306_v28 }
 0x249   :  { %935 = vmatpush1.bf16.msra.mxu0 %v2316_v30  ;;  %976 = vmatpush1.bf16.msra.mxu1 %v2321_v31 }
 0x24a   :  { %936 = vmatprep.subr.bf16.mxu0 %v2328_v32  ;;  %977 = vmatprep.subr.bf16.mxu1 %v2335_v33 }
 0x24d   :  { %937 = vmatpush1.bf16.msra.mxu0 %v2342_v34  ;;  %978 = vmatpush1.bf16.msra.mxu1 %v2347_v35 }
 0x24e   :  { %938 = vmatprep.subr.bf16.mxu0 %v2354_v36  ;;  %979 = vmatprep.subr.bf16.mxu1 %v2361_v37 }
 0x251   :  { %939 = vmatpush1.bf16.msra.mxu0 %v2379_v40  ;;  %980 = vmatpush1.bf16.msra.mxu1 %v2384_v41 }
 0x252   :  { %940 = vmatprep.subr.bf16.mxu0 %v2392_v43  ;;  %981 = vmatprep.subr.bf16.mxu1 %v2397_v44 }
 0x255   :  { %941 = vmatpush1.bf16.msra.mxu0 %v2407_v45  ;;  %982 = vmatpush1.bf16.msra.mxu1 %v2412_v46 }
 0x256   :  { %1058 = vmatprep.subr.bf16.mxu0 %v2198_v10  ;;  %1099 = vmatprep.subr.bf16.mxu1 %v2203_v11 }
 0x30b   :  { %v828_v29 = vpop.f32.mrb[24].mxu0  ;;  %v869_v48 = vpop.f32.mrb[24].mxu1 }
 0x30c   :  { %v876_v57 = vadd.f32 %v828_v29, %v3146_v51  ;;  %v878_v47 = vadd.f32 %v869_v48, %v3147_v58  ;;  %v830_v59 = vpop.f32.mrb[25].mxu0  ;;  %v871_v39 = vpop.f32.mrb[25].mxu1 }
 0x30d   :  { %v877_v54 = vadd.f32 %v830_v59, %v3148_v60  ;;  %v879_v56 = vadd.f32 %v871_v39, %v3149_v55  ;;  %v832_v49 = vpop.f32.mrb[26].mxu0  ;;  %v873_v5 = vpop.f32.mrb[26].mxu1 }
 0x30e   :  { %v880_v2 = vadd.f32 %v876_v57, %v2527_v42  ;;  %v833_v0 = vpop.f32.mrb[27].mxu0  ;;  %v874_v4 = vpop.f32.mrb[27].mxu1  ;;  %v882_v38 = vadd.f32 %v878_v47, %v2533_v50 }
 0x30f   :  { %v881_v63 = vadd.f32 %v877_v54, %v2529_v8  ;;  %v883_v61 = vadd.f32 %v879_v56, %v2535_v53  ;;  %v914_v59 = vpop.permute.xlu1 %913 }
 0x310   :  { %v1767_v3 = vmul.f32 -1.442695, %v880_v2  ;;  %v1769_v7 = vmul.f32 -1.442695, %v882_v38  ;;  %vm915_vm13 = vcmp.eq.s32.totalorder %v914_v59, 1 }
 0x311   :  { %v1768_v6 = vmul.f32 -1.442695, %v881_v63 }
 0x312   :  { %1977 = vpow2.f32 %v1767_v3  ;;  %v3153_v3 = vld [vmem:[#allocation14_spill] sm:$0xff] }
 0x313   :  { %1979 = vpow2.f32 %v1768_v6 }
 0x314   :  { %1981 = vtanh.f32 %v883_v61 }
 0x315   :  { %1983 = vpow2.f32 %v1769_v7 }
 0x31c   :  { %v1978_v1 = vpop.eup %1977 }
 0x31d   :  { %v893_v9 = vadd.f32 1.0, %v1978_v1  ;;  %v1980_v29 = vpop.eup %1979 }
 0x31e   :  { %v894_v48 = vadd.f32 1.0, %v1980_v29  ;;  %v1982_v51 = vpop.eup %1981 }
 0x31f   :  { %1985 = vrcp.f32 %v893_v9  ;;  %v1984_v57 = vpop.eup %1983 }
 0x320   :  { %1987 = vrcp.f32 %v894_v48  ;;  %v895_v54 = vadd.f32 1.0, %v1984_v57 }
 0x322   :  { %1989 = vrcp.f32 %v895_v54 }
 0x329   :  { %v1986_v58 = vpop.eup %1985 }
 0x32a   :  { %v904_v39 = vmul.f32 %v1986_v58, %v1982_v51  ;;  %v1988_v60 = vpop.eup %1987 }
 0x32b   :  { %v903_v47 = vmul.f32 %v1988_v60, %v2605_v62 }
 0x32c   :  { %v1990_v49 = vpop.eup %1989 }
 0x32d   :  { %v905_v55 = vadd.f32 %v904_v39, %v903_v47 }
 0x32f   :  { %1991 = vtanh.f32 %v905_v55  ;;  %v2658_v56 = vsel %vm915_vm13, %v905_v55, %v2605_v62 }
 0x339   :  { %v1992_v5 = vpop.eup %1991 }
 0x33a   :  { %v907_v2 = vmul.f32 %v1992_v5, %v1990_v49 }
 0x33c   :  { %v2661_v0 = vsel %vm915_vm13, %v907_v2, %v2610_v19  ;;  %v3152_v19 = vld [vmem:[#allocation13_spill] sm:$0xff] }
 0x33d   :  { %v925_v4 = vpack.c.bf16 %v2661_v0, %v2661_v0 }
 0x33f   :  { %959 = vmatmul.mubr.bf16.vlgmr.msra.gmra.mrb[28].mxu0 %v925_v4  ;;  %1000 = vmatmul.mubr.bf16.vlgmr.msra.gmra.mrb[28].mxu1 %v925_v4 }
 0x340   :  { %1059 = vmatpush1.bf16.msra.mxu0 %v2208_v12  ;;  %1100 = vmatpush1.bf16.msra.mxu1 %v2213_v13 }
 0x341   :  { %1060 = vmatprep.subr.bf16.mxu0 %v2219_v14  ;;  %1101 = vmatprep.subr.bf16.mxu1 %v2225_v15  ;;  %v3150_v14 = vld [vmem:[#allocation11_spill] sm:$0xff] }
 0x342   :  { %1090 = vmatprep.mubr.bf16.mxu0 %v3145_v52  ;;  %1131 = vmatprep.mubr.bf16.mxu1 %v3145_v52 }
 0x344   :  { %1061 = vmatpush1.bf16.msra.mxu0 %v2232_v16  ;;  %1102 = vmatpush1.bf16.msra.mxu1 %v2239_v17  ;;  %v3151_v16 = vld [vmem:[#allocation12_spill] sm:$0xff] }
 0x345   :  { %1062 = vmatprep.subr.bf16.mxu0 %v2246_v18  ;;  %1103 = vmatprep.subr.bf16.mxu1 %v2256_v20 }
 0x348   :  { %1063 = vmatpush1.bf16.msra.mxu0 %v2261_v21  ;;  %1104 = vmatpush1.bf16.msra.mxu1 %v2268_v22 }
 0x349   :  { %1064 = vmatprep.subr.bf16.mxu0 %v2275_v23  ;;  %1105 = vmatprep.subr.bf16.mxu1 %v2280_v24 }
 0x34c   :  { %1065 = vmatpush1.bf16.msra.mxu0 %v2287_v25  ;;  %1106 = vmatpush1.bf16.msra.mxu1 %v2294_v26 }
 0x34d   :  { %1066 = vmatprep.subr.bf16.mxu0 %v2301_v27  ;;  %1107 = vmatprep.subr.bf16.mxu1 %v2306_v28 }
 0x350   :  { %1067 = vmatpush1.bf16.msra.mxu0 %v2316_v30  ;;  %1108 = vmatpush1.bf16.msra.mxu1 %v2321_v31 }
 0x351   :  { %1068 = vmatprep.subr.bf16.mxu0 %v2328_v32  ;;  %1109 = vmatprep.subr.bf16.mxu1 %v2335_v33 }
 0x354   :  { %1069 = vmatpush1.bf16.msra.mxu0 %v2342_v34  ;;  %1110 = vmatpush1.bf16.msra.mxu1 %v2347_v35 }
 0x355   :  { %1070 = vmatprep.subr.bf16.mxu0 %v2354_v36  ;;  %1111 = vmatprep.subr.bf16.mxu1 %v2361_v37 }
 0x358   :  { %1071 = vmatpush1.bf16.msra.mxu0 %v2379_v40  ;;  %1112 = vmatpush1.bf16.msra.mxu1 %v2384_v41 }
 0x359   :  { %1072 = vmatprep.subr.bf16.mxu0 %v2392_v43  ;;  %1113 = vmatprep.subr.bf16.mxu1 %v2397_v44 }
 0x35c   :  { %1073 = vmatpush1.bf16.msra.mxu0 %v2407_v45  ;;  %1114 = vmatpush1.bf16.msra.mxu1 %v2412_v46 }
 0x35d   :  { %1190 = vmatprep.subr.bf16.mxu0 %v2198_v10  ;;  %1231 = vmatprep.subr.bf16.mxu1 %v2203_v11 }
 0x412   :  { %v960_v12 = vpop.f32.mrb[28].mxu0  ;;  %v1001_v13 = vpop.f32.mrb[28].mxu1 }
 0x413   :  { %v1008_v15 = vadd.f32 %v960_v12, %v3150_v14  ;;  %v1010_v17 = vadd.f32 %v1001_v13, %v3151_v16  ;;  %v962_v18 = vpop.f32.mrb[29].mxu0  ;;  %v1003_v62 = vpop.f32.mrb[29].mxu1 }
 0x414   :  { %v1009_v63 = vadd.f32 %v962_v18, %v3152_v19  ;;  %v1011_v6 = vadd.f32 %v1003_v62, %v3153_v3  ;;  %v964_v38 = vpop.f32.mrb[30].mxu0  ;;  %v1005_v61 = vpop.f32.mrb[30].mxu1  ;;  %v2719_v19 = vld [vmem:[%s3108_s4] ss:$16 sps:$4 sm:$0xff]  }
 0x415   :  { %v1012_v7 = vadd.f32 %v1008_v15, %v2527_v42  ;;  %v965_v1 = vpop.f32.mrb[31].mxu0  ;;  %v1006_v10 = vpop.f32.mrb[31].mxu1  ;;  %v1014_v48 = vadd.f32 %v1010_v17, %v2533_v50  ;;  %v2745_v3 = vld [vmem:[%s3108_s4 + $0x20] ss:$16 sps:$4 sm:$0xff]   ;;  %v2757_v38 = vld [vmem:[%s3108_s4 + $0x44] ss:$16 sps:$4 sm:$0xff]  }
 0x416   :  { %v1013_v11 = vadd.f32 %v1009_v63, %v2529_v8  ;;  %v1015_v51 = vadd.f32 %v1011_v6, %v2535_v53  ;;  %v1046_v12 = vpop.permute.xlu1 %1045  ;;  %v2737_v63 = vld [vmem:[%s3108_s4 + $0x2c] ss:$16 sps:$4 sm:$0xff]   ;;  %v2751_v6 = vld [vmem:[%s3108_s4 + $0x28] ss:$16 sps:$4 sm:$0xff]  }
 0x417   :  { %v1771_v9 = vmul.f32 -1.442695, %v1012_v7  ;;  %v1773_v57 = vmul.f32 -1.442695, %v1014_v48  ;;  %vm1047_vm14 = vcmp.eq.s32.totalorder %v1046_v12, 1 }
 0x418   :  { %v1772_v29 = vmul.f32 -1.442695, %v1013_v11  ;;  %v2824_v12 = vld [vmem:[%s3108_s4 + $0x4c] ss:$16 sps:$4 sm:$0xff]  }
 0x419   :  { %1993 = vpow2.f32 %v1771_v9 }
 0x41a   :  { %1995 = vpow2.f32 %v1772_v29 }
 0x41b   :  { %1997 = vtanh.f32 %v1015_v51 }
 0x41c   :  { %1999 = vpow2.f32 %v1773_v57 }
 0x423   :  { %v1994_v58 = vpop.eup %1993 }
 0x424   :  { %v1025_v59 = vadd.f32 1.0, %v1994_v58  ;;  %v1996_v39 = vpop.eup %1995 }
 0x425   :  { %v1026_v60 = vadd.f32 1.0, %v1996_v39  ;;  %v1998_v54 = vpop.eup %1997 }
 0x426   :  { %2001 = vrcp.f32 %v1025_v59  ;;  %v2000_v47 = vpop.eup %1999 }
 0x427   :  { %2003 = vrcp.f32 %v1026_v60  ;;  %v1027_v2 = vadd.f32 1.0, %v2000_v47  ;;  %v1178_v60 = vpop.permute.xlu0 %1177 }
 0x428   :  { %vm1179_vm15 = vcmp.eq.s32.totalorder %v1178_v60, 1 }
 0x429   :  { %2005 = vrcp.f32 %v1027_v2 }
 0x430   :  { %v2002_v55 = vpop.eup %2001 }
 0x431   :  { %v1036_v49 = vmul.f32 %v2002_v55, %v1998_v54  ;;  %v2004_v5 = vpop.eup %2003 }
 0x432   :  { %v1035_v4 = vmul.f32 %v2004_v5, %v2658_v56 }
 0x433   :  { %v2006_v15 = vpop.eup %2005 }
 0x434   :  { %v1037_v13 = vadd.f32 %v1036_v49, %v1035_v4 }
 0x436   :  { %2007 = vtanh.f32 %v1037_v13  ;;  %v2709_v14 = vsel %vm1047_vm14, %v1037_v13, %v2658_v56  ;;  %v2725_v56 = vld [vmem:[%s3108_s4 + $0x8] ss:$16 sps:$4 sm:$0xff]   ;;  %v2830_v13 = vld [vmem:[%s3108_s4 + $0x40] ss:$16 sps:$4 sm:$0xff]  }
 0x440   :  { %v2008_v16 = vpop.eup %2007 }
 0x441   :  { %v1039_v17 = vmul.f32 %v2008_v16, %v2006_v15  ;;  %v2842_v15 = vld [vmem:[%s3108_s4 + $0x64] ss:$16 sps:$4 sm:$0xff]   ;;  %v2848_v16 = vld [vmem:[%s3108_s4 + $0x6c] ss:$16 sps:$4 sm:$0xff]  }
 0x443   :  { %v2712_v18 = vsel %vm1047_vm14, %v1039_v17, %v2661_v0  ;;  %v2731_v0 = vld [vmem:[%s3108_s4 + $0x24] ss:$16 sps:$4 sm:$0xff]   ;;  %v2854_v17 = vld [vmem:[%s3108_s4 + $0x60] ss:$16 sps:$4 sm:$0xff]  }
 0x444   :  { %v1057_v62 = vpack.c.bf16 %v2712_v18, %v2712_v18 }
 0x446   :  { %1091 = vmatmul.mubr.bf16.vlgmr.msra.gmra.mrb[32].mxu0 %v1057_v62  ;;  %1132 = vmatmul.mubr.bf16.vlgmr.msra.gmra.mrb[32].mxu1 %v1057_v62  ;;  %v2866_v62 = vld [vmem:[%s3108_s4 + $0x84] ss:$16 sps:$4 sm:$0xff]  }
 0x447   :  { %1191 = vmatpush1.bf16.msra.mxu0 %v2719_v19  ;;  %1232 = vmatpush1.bf16.msra.mxu1 %v2725_v56 }
 0x448   :  { %1192 = vmatprep.subr.bf16.mxu0 %v2731_v0  ;;  %1233 = vmatprep.subr.bf16.mxu1 %v2737_v63 }
 0x449   :  { %1222 = vmatprep.mubr.bf16.mxu0 %v3145_v52  ;;  %1263 = vmatprep.mubr.bf16.mxu1 %v3145_v52 }
 0x44b   :  { %1193 = vmatpush1.bf16.msra.mxu0 %v2745_v3  ;;  %1234 = vmatpush1.bf16.msra.mxu1 %v2751_v6 }
 0x44c   :  { %1194 = vmatprep.subr.bf16.mxu0 %v2757_v38  ;;  %1235 = vmatprep.subr.bf16.mxu1 %v2256_v20  ;;  %v2786_v20 = vld [vmem:[%s3108_s4 + $0x4] ss:$16 sps:$4 sm:$0xff]  }
 0x44f   :  { %1195 = vmatpush1.bf16.msra.mxu0 %v2261_v21  ;;  %1236 = vmatpush1.bf16.msra.mxu1 %v2268_v22  ;;  %v2792_v21 = vld [vmem:[%s3108_s4 + $0xc] ss:$16 sps:$4 sm:$0xff]  }
 0x450   :  { %1196 = vmatprep.subr.bf16.mxu0 %v2275_v23  ;;  %1237 = vmatprep.subr.bf16.mxu1 %v2280_v24  ;;  %v3154_v24 = vld [vmem:[#allocation15_spill] sm:$0xff] }
 0x453   :  { %1197 = vmatpush1.bf16.msra.mxu0 %v2287_v25  ;;  %1238 = vmatpush1.bf16.msra.mxu1 %v2294_v26  ;;  %v3155_v26 = vld [vmem:[#allocation16_spill] sm:$0xff] }
 0x454   :  { %1198 = vmatprep.subr.bf16.mxu0 %v2301_v27  ;;  %1239 = vmatprep.subr.bf16.mxu1 %v2306_v28 }
 0x457   :  { %1199 = vmatpush1.bf16.msra.mxu0 %v2316_v30  ;;  %1240 = vmatpush1.bf16.msra.mxu1 %v2321_v31  ;;  %v3156_v31 = vld [vmem:[#allocation17_spill] sm:$0xff] }
 0x458   :  { %1200 = vmatprep.subr.bf16.mxu0 %v2328_v32  ;;  %1241 = vmatprep.subr.bf16.mxu1 %v2335_v33  ;;  %v3157_v33 = vld [vmem:[#allocation18_spill] sm:$0xff] }
 0x45b   :  { %1201 = vmatpush1.bf16.msra.mxu0 %v2342_v34  ;;  %1242 = vmatpush1.bf16.msra.mxu1 %v2347_v35 }
 0x45c   :  { %1202 = vmatprep.subr.bf16.mxu0 %v2354_v36  ;;  %1243 = vmatprep.subr.bf16.mxu1 %v2361_v37 }
 0x45f   :  { %1203 = vmatpush1.bf16.msra.mxu0 %v2379_v40  ;;  %1244 = vmatpush1.bf16.msra.mxu1 %v2384_v41 }
 0x460   :  { %1204 = vmatprep.subr.bf16.mxu0 %v2392_v43  ;;  %1245 = vmatprep.subr.bf16.mxu1 %v2397_v44 }
 0x463   :  { %1205 = vmatpush1.bf16.msra.mxu0 %v2407_v45  ;;  %1246 = vmatpush1.bf16.msra.mxu1 %v2412_v46 }
 0x464   :  { %1322 = vmatprep.subr.bf16.mxu0 %v2786_v20  ;;  %1363 = vmatprep.subr.bf16.mxu1 %v2792_v21 }
 0x519   :  { %v1092_v22 = vpop.f32.mrb[32].mxu0  ;;  %v1133_v23 = vpop.f32.mrb[32].mxu1 }
 0x51a   :  { %v1140_v25 = vadd.f32 %v1092_v22, %v3154_v24  ;;  %v1142_v27 = vadd.f32 %v1133_v23, %v3155_v26  ;;  %v1094_v28 = vpop.f32.mrb[33].mxu0  ;;  %v1135_v30 = vpop.f32.mrb[33].mxu1  ;;  %v2872_v22 = vld [vmem:[%s3108_s4 + $0x8c] ss:$16 sps:$4 sm:$0xff]   ;;  %v2878_v23 = vld [vmem:[%s3108_s4 + $0x80] ss:$16 sps:$4 sm:$0xff]  }
 0x51b   :  { %v1141_v32 = vadd.f32 %v1094_v28, %v3156_v31  ;;  %v1143_v34 = vadd.f32 %v1135_v30, %v3157_v33  ;;  %v1096_v35 = vpop.f32.mrb[34].mxu0  ;;  %v1137_v36 = vpop.f32.mrb[34].mxu1  ;;  %v2884_v24 = vld [vmem:[%s3108_s4 + $0x88] ss:$16 sps:$4 sm:$0xff]   ;;  %v2896_v26 = vld [vmem:[%s3108_s4 + $0xac] ss:$16 sps:$4 sm:$0xff]  }
 0x51c   :  { %v1144_v37 = vadd.f32 %v1140_v25, %v2527_v42  ;;  %v1097_v40 = vpop.f32.mrb[35].mxu0  ;;  %v1138_v41 = vpop.f32.mrb[35].mxu1  ;;  %v1146_v46 = vadd.f32 %v1142_v27, %v2533_v50  ;;  %v2890_v25 = vld [vmem:[%s3108_s4 + $0xa4] ss:$16 sps:$4 sm:$0xff]   ;;  %v2902_v27 = vld [vmem:[%s3108_s4 + $0xa0] ss:$16 sps:$4 sm:$0xff]  }
 0x51d   :  { %v1145_v43 = vadd.f32 %v1141_v32, %v2529_v8  ;;  %v1147_v61 = vadd.f32 %v1143_v34, %v2535_v53  ;;  %v2908_v28 = vld [vmem:[%s3108_s4 + $0xa8] ss:$16 sps:$4 sm:$0xff]   ;;  %v2914_v30 = vld [vmem:[%s3108_s4 + $0xc4] ss:$16 sps:$4 sm:$0xff]   ;;  %v2920_v31 = vld [vmem:[%s3108_s4 + $0xcc] ss:$16 sps:$4 sm:$0xff]  }
 0x51e   :  { %v1775_v44 = vmul.f32 -1.442695, %v1144_v37  ;;  %v1777_v7 = vmul.f32 -1.442695, %v1146_v46  ;;  %v2926_v32 = vld [vmem:[%s3108_s4 + $0xc0] ss:$16 sps:$4 sm:$0xff]  }
 0x51f   :  { %v1776_v45 = vmul.f32 -1.442695, %v1145_v43  ;;  %v2932_v33 = vld [vmem:[%s3108_s4 + $0xc8] ss:$16 sps:$4 sm:$0xff]   ;;  %v2938_v34 = vld [vmem:[%s3108_s4 + $0xe4] ss:$16 sps:$4 sm:$0xff]  }
 0x520   :  { %2009 = vpow2.f32 %v1775_v44  ;;  %v2944_v35 = vld [vmem:[%s3108_s4 + $0xec] ss:$16 sps:$4 sm:$0xff]   ;;  %v2950_v36 = vld [vmem:[%s3108_s4 + $0xe0] ss:$16 sps:$4 sm:$0xff]   ;;  %v2956_v37 = vld [vmem:[%s3108_s4 + $0xe8] ss:$16 sps:$4 sm:$0xff]  }
 0x521   :  { %2011 = vpow2.f32 %v1776_v45  ;;  %v3158_v43 = vld [vmem:[#allocation19_spill] sm:$0xff]  ;;  %v3159_v45 = vld [vmem:[#allocation20_spill] sm:$0xff] }
 0x522   :  { %2013 = vtanh.f32 %v1147_v61 }
 0x523   :  { %2015 = vpow2.f32 %v1777_v7 }
 0x52a   :  { %v2010_v1 = vpop.eup %2009 }
 0x52b   :  { %v1157_v10 = vadd.f32 1.0, %v2010_v1  ;;  %v2012_v11 = vpop.eup %2011  ;;  %v3160_v1 = vld [vmem:[#allocation21_spill] sm:$0xff] }
 0x52c   :  { %v1158_v9 = vadd.f32 1.0, %v2012_v11  ;;  %v2014_v29 = vpop.eup %2013  ;;  %v3161_v11 = vld [vmem:[#allocation22_spill] sm:$0xff] }
 0x52d   :  { %2017 = vrcp.f32 %v1157_v10  ;;  %v2016_v48 = vpop.eup %2015 }
 0x52e   :  { %2019 = vrcp.f32 %v1158_v9  ;;  %v1159_v59 = vadd.f32 1.0, %v2016_v48 }
 0x530   :  { %2021 = vrcp.f32 %v1159_v59 }
 0x537   :  { %v2018_v51 = vpop.eup %2017 }
 0x538   :  { %v1168_v57 = vmul.f32 %v2018_v51, %v2014_v29  ;;  %v2020_v58 = vpop.eup %2019 }
 0x539   :  { %v1167_v39 = vmul.f32 %v2020_v58, %v2709_v14 }
 0x53a   :  { %v2022_v55 = vpop.eup %2021 }
 0x53b   :  { %v1169_v54 = vadd.f32 %v1168_v57, %v1167_v39 }
 0x53d   :  { %2023 = vtanh.f32 %v1169_v54  ;;  %v2805_v47 = vsel %vm1179_vm15, %v1169_v54, %v2709_v14  ;;  %v2836_v14 = vld [vmem:[%s3108_s4 + $0x48] ss:$16 sps:$4 sm:$0xff]  }
 0x547   :  { %v2024_v49 = vpop.eup %2023 }
 0x548   :  { %v1171_v5 = vmul.f32 %v2024_v49, %v2022_v55 }
 0x54a   :  { %v2808_v2 = vsel %vm1179_vm15, %v1171_v5, %v2712_v18  ;;  %v2860_v18 = vld [vmem:[%s3108_s4 + $0x68] ss:$16 sps:$4 sm:$0xff]  }
 0x54b   :  { %v1189_v4 = vpack.c.bf16 %v2808_v2, %v2808_v2 }
 0x54d   :  { %1223 = vmatmul.mubr.bf16.vlgmr.msra.gmra.mrb[36].mxu0 %v1189_v4  ;;  %1264 = vmatmul.mubr.bf16.vlgmr.msra.gmra.mrb[36].mxu1 %v1189_v4 }
 0x54e   :  { %1323 = vmatpush1.bf16.msra.mxu0 %v2719_v19  ;;  %1364 = vmatpush1.bf16.msra.mxu1 %v2725_v56 }
 0x54f   :  { %1324 = vmatprep.subr.bf16.mxu0 %v2731_v0  ;;  %1365 = vmatprep.subr.bf16.mxu1 %v2737_v63 }
 0x550   :  { %1354 = vmatprep.mubr.bf16.mxu0 %v3145_v52  ;;  %1395 = vmatprep.mubr.bf16.mxu1 %v3145_v52 }
 0x552   :  { %1325 = vmatpush1.bf16.msra.mxu0 %v2745_v3  ;;  %1366 = vmatpush1.bf16.msra.mxu1 %v2751_v6 }
 0x553   :  { %1326 = vmatprep.subr.bf16.mxu0 %v2757_v38  ;;  %1367 = vmatprep.subr.bf16.mxu1 %v2824_v12 }
 0x556   :  { %1327 = vmatpush1.bf16.msra.mxu0 %v2830_v13  ;;  %1368 = vmatpush1.bf16.msra.mxu1 %v2836_v14 }
 0x557   :  { %1328 = vmatprep.subr.bf16.mxu0 %v2842_v15  ;;  %1369 = vmatprep.subr.bf16.mxu1 %v2848_v16 }
 0x55a   :  { %1329 = vmatpush1.bf16.msra.mxu0 %v2854_v17  ;;  %1370 = vmatpush1.bf16.msra.mxu1 %v2860_v18 }
 0x55b   :  { %1330 = vmatprep.subr.bf16.mxu0 %v2866_v62  ;;  %1371 = vmatprep.subr.bf16.mxu1 %v2872_v22 }
 0x55e   :  { %1331 = vmatpush1.bf16.msra.mxu0 %v2878_v23  ;;  %1372 = vmatpush1.bf16.msra.mxu1 %v2884_v24 }
 0x55f   :  { %1332 = vmatprep.subr.bf16.mxu0 %v2890_v25  ;;  %1373 = vmatprep.subr.bf16.mxu1 %v2896_v26 }
 0x562   :  { %1333 = vmatpush1.bf16.msra.mxu0 %v2902_v27  ;;  %1374 = vmatpush1.bf16.msra.mxu1 %v2908_v28 }
 0x563   :  { %1334 = vmatprep.subr.bf16.mxu0 %v2914_v30  ;;  %1375 = vmatprep.subr.bf16.mxu1 %v2920_v31 }
 0x566   :  { %1335 = vmatpush1.bf16.msra.mxu0 %v2926_v32  ;;  %1376 = vmatpush1.bf16.msra.mxu1 %v2932_v33 }
 0x567   :  { %1336 = vmatprep.subr.bf16.mxu0 %v2938_v34  ;;  %1377 = vmatprep.subr.bf16.mxu1 %v2944_v35 }
 0x56a   :  { %1337 = vmatpush1.bf16.msra.mxu0 %v2950_v36  ;;  %1378 = vmatpush1.bf16.msra.mxu1 %v2956_v37 }
 0x56b   :  { %1454 = vmatprep.subr.bf16.mxu0 %v2786_v20  ;;  %1495 = vmatprep.subr.bf16.mxu1 %v2792_v21 }
 0x620   :  { %v1224_v40 = vpop.f32.mrb[36].mxu0  ;;  %v1265_v41 = vpop.f32.mrb[36].mxu1 }
 0x621   :  { %v1272_v44 = vadd.f32 %v1224_v40, %v3158_v43  ;;  %v1274_v46 = vadd.f32 %v1265_v41, %v3159_v45  ;;  %v1226_v61 = vpop.f32.mrb[37].mxu0  ;;  %v1267_v7 = vpop.f32.mrb[37].mxu1 }
 0x622   :  { %v1273_v10 = vadd.f32 %v1226_v61, %v3160_v1  ;;  %v1275_v9 = vadd.f32 %v1267_v7, %v3161_v11  ;;  %v1228_v29 = vpop.f32.mrb[38].mxu0  ;;  %v1269_v48 = vpop.f32.mrb[38].mxu1 }
 0x623   :  { %v1276_v51 = vadd.f32 %v1272_v44, %v2527_v42  ;;  %v1229_v57 = vpop.f32.mrb[39].mxu0  ;;  %v1270_v20 = vpop.f32.mrb[39].mxu1  ;;  %v1278_v39 = vadd.f32 %v1274_v46, %v2533_v50 }
 0x624   :  { %v1277_v21 = vadd.f32 %v1273_v10, %v2529_v8  ;;  %v1279_v60 = vadd.f32 %v1275_v9, %v2535_v53  ;;  %v1310_v46 = vpop.permute.xlu1 %1309 }
 0x625   :  { %v1779_v58 = vmul.f32 -1.442695, %v1276_v51  ;;  %v1781_v54 = vmul.f32 -1.442695, %v1278_v39  ;;  %vm1311_vm0 = vcmp.eq.s32.totalorder %v1310_v46, 1  ;;  %v1600_v46 = vld [vmem:[%s3112_s6 + $0x30] sm:$0xff] }
 0x626   :  { %v1780_v59 = vmul.f32 -1.442695, %v1277_v21  ;;  %v1442_v21 = vpop.permute.xlu0 %1441 }
 0x627   :  { %2025 = vpow2.f32 %v1779_v58  ;;  %vm1443_vm1 = vcmp.eq.s32.totalorder %v1442_v21, 1 }
 0x628   :  { %2027 = vpow2.f32 %v1780_v59 }
 0x629   :  { %2029 = vtanh.f32 %v1279_v60 }
 0x62a   :  { %2031 = vpow2.f32 %v1781_v54 }
 0x631   :  { %v2026_v55 = vpop.eup %2025 }
 0x632   :  { %v1289_v49 = vadd.f32 1.0, %v2026_v55  ;;  %v2028_v5 = vpop.eup %2027 }
 0x633   :  { %v1290_v4 = vadd.f32 1.0, %v2028_v5  ;;  %v2030_v40 = vpop.eup %2029  ;;  %v1594_v5 = vld [vmem:[%s3112_s6] sm:$0xff] }
 0x634   :  { %2033 = vrcp.f32 %v1289_v49  ;;  %v2032_v41 = vpop.eup %2031 }
 0x635   :  { %2035 = vrcp.f32 %v1290_v4  ;;  %v1291_v61 = vadd.f32 1.0, %v2032_v41  ;;  %v1595_v4 = vld [vmem:[%s3112_s6 + $0x8] sm:$0xff]  ;;  %v1596_v41 = vld [vmem:[%s3112_s6 + $0x10] sm:$0xff] }
 0x637   :  { %2037 = vrcp.f32 %v1291_v61  ;;  %v1599_v61 = vld [vmem:[%s3112_s6 + $0x28] sm:$0xff] }
 0x63e   :  { %v2034_v43 = vpop.eup %2033 }
 0x63f   :  { %v1300_v44 = vmul.f32 %v2034_v43, %v2030_v40  ;;  %v2036_v45 = vpop.eup %2035  ;;  %v1852_v40 = vpack.c.bf16 %v1595_v4, %v1594_v5  ;;  %v1597_v43 = vld [vmem:[%s3112_s6 + $0x18] sm:$0xff] }
 0x640   :  { %v1299_v7 = vmul.f32 %v2036_v45, %v2805_v47  ;;  %v1598_v45 = vld [vmem:[%s3112_s6 + $0x20] sm:$0xff] }
 0x641   :  { %v2038_v11 = vpop.eup %2037 }
 0x642   :  { %v1301_v1 = vadd.f32 %v1300_v44, %v1299_v7  ;;  %v1855_v44 = vpack.c.bf16 %v1597_v43, %v1596_v41  ;;  %v1858_v7 = vpack.c.bf16 %v1599_v61, %v1598_v45 }
 0x644   :  { %2039 = vtanh.f32 %v1301_v1  ;;  %v2971_v10 = vsel %vm1311_vm0, %v1301_v1, %v2805_v47  ;;  %v1601_v1 = vld [vmem:[%s3112_s6 + $0x38] sm:$0xff] }
 0x64e   :  { %v2040_v9 = vpop.eup %2039 }
 0x64f   :  { %v1303_v29 = vmul.f32 %v2040_v9, %v2038_v11  ;;  %v1602_v11 = vld [vmem:[%s3112_s6 + $0x40] sm:$0xff]  ;;  %v1603_v9 = vld [vmem:[%s3112_s6 + $0x48] sm:$0xff] }
 0x651   :  { %v2974_v48 = vsel %vm1311_vm0, %v1303_v29, %v2808_v2  ;;  %v3165_v2 = vld [vmem:[#allocation25_spill] sm:$0xff]  ;;  %v1864_v29 = vpack.c.bf16 %v1603_v9, %v1602_v11 }
 0x652   :  { %v1321_v51 = vpack.c.bf16 %v2974_v48, %v2974_v48 }
 0x654   :  { %1355 = vmatmul.mubr.bf16.vlgmr.msra.gmra.mrb[40].mxu0 %v1321_v51  ;;  %1396 = vmatmul.mubr.bf16.vlgmr.msra.gmra.mrb[40].mxu1 %v1321_v51  ;;  %v1605_v51 = vld [vmem:[%s3112_s6 + $0x58] sm:$0xff] }
 0x655   :  { %1455 = vmatpush1.bf16.msra.mxu0 %v2719_v19  ;;  %1496 = vmatpush1.bf16.msra.mxu1 %v2725_v56 }
 0x656   :  { %1456 = vmatprep.subr.bf16.mxu0 %v2731_v0  ;;  %1497 = vmatprep.subr.bf16.mxu1 %v2737_v63  ;;  %v3163_v0 = vld [vmem:[#allocation23_spill] sm:$0xff] }
 0x657   :  { %1486 = vmatprep.mubr.bf16.mxu0 %v3145_v52  ;;  %1527 = vmatprep.mubr.bf16.mxu1 %v3145_v52  ;;  %v3162_v52 = vmov 0.0|0.0  }
 0x659   :  { %1457 = vmatpush1.bf16.msra.mxu0 %v2745_v3  ;;  %1498 = vmatpush1.bf16.msra.mxu1 %v2751_v6  ;;  %v3164_v3 = vld [vmem:[#allocation24_spill] sm:$0xff] }
 0x65a   :  { %1458 = vmatprep.subr.bf16.mxu0 %v2757_v38  ;;  %1499 = vmatprep.subr.bf16.mxu1 %v2824_v12 }
 0x65d   :  { %1459 = vmatpush1.bf16.msra.mxu0 %v2830_v13  ;;  %1500 = vmatpush1.bf16.msra.mxu1 %v2836_v14  ;;  %v3166_v13 = vld [vmem:[#allocation26_spill] sm:$0xff] }
 0x65e   :  { %1460 = vmatprep.subr.bf16.mxu0 %v2842_v15  ;;  %1501 = vmatprep.subr.bf16.mxu1 %v2848_v16 }
 0x661   :  { %1461 = vmatpush1.bf16.msra.mxu0 %v2854_v17  ;;  %1502 = vmatpush1.bf16.msra.mxu1 %v2860_v18 }
 0x662   :  { %1462 = vmatprep.subr.bf16.mxu0 %v2866_v62  ;;  %1503 = vmatprep.subr.bf16.mxu1 %v2872_v22 }
 0x665   :  { %1463 = vmatpush1.bf16.msra.mxu0 %v2878_v23  ;;  %1504 = vmatpush1.bf16.msra.mxu1 %v2884_v24 }
 0x666   :  { %1464 = vmatprep.subr.bf16.mxu0 %v2890_v25  ;;  %1505 = vmatprep.subr.bf16.mxu1 %v2896_v26 }
 0x669   :  { %1465 = vmatpush1.bf16.msra.mxu0 %v2902_v27  ;;  %1506 = vmatpush1.bf16.msra.mxu1 %v2908_v28 }
 0x66a   :  { %1466 = vmatprep.subr.bf16.mxu0 %v2914_v30  ;;  %1507 = vmatprep.subr.bf16.mxu1 %v2920_v31 }
 0x66d   :  { %1467 = vmatpush1.bf16.msra.mxu0 %v2926_v32  ;;  %1508 = vmatpush1.bf16.msra.mxu1 %v2932_v33 }
 0x66e   :  { %1468 = vmatprep.subr.bf16.mxu0 %v2938_v34  ;;  %1509 = vmatprep.subr.bf16.mxu1 %v2944_v35 }
 0x671   :  { %1469 = vmatpush1.bf16.msra.mxu0 %v2950_v36  ;;  %1510 = vmatpush1.bf16.msra.mxu1 %v2956_v37 }
 0x672   :  { %1851 = vmatprep.subr.bf16.mxu0 %v3162_v52 }
 0x727   :  { %v1356_v19 = vpop.f32.mrb[40].mxu0  ;;  %v1397_v56 = vpop.f32.mrb[40].mxu1 }
 0x728   :  { %v1404_v63 = vadd.f32 %v1356_v19, %v3163_v0  ;;  %v1406_v6 = vadd.f32 %v1397_v56, %v3164_v3  ;;  %v1358_v38 = vpop.f32.mrb[41].mxu0  ;;  %v1399_v47 = vpop.f32.mrb[41].mxu1  ;;  %v1606_v56 = vld [vmem:[%s3112_s6 + $0x60] sm:$0xff]  ;;  %v1607_v0 = vld [vmem:[%s3112_s6 + $0x68] sm:$0xff] }
 0x729   :  { %v1405_v12 = vadd.f32 %v1358_v38, %v3165_v2  ;;  %v1407_v14 = vadd.f32 %v1399_v47, %v3166_v13  ;;  %v1360_v15 = vpop.f32.mrb[42].mxu0  ;;  %v1401_v16 = vpop.f32.mrb[42].mxu1  ;;  %v1870_v3 = vpack.c.bf16 %v1607_v0, %v1606_v56  ;;  %v1609_v38 = vld [vmem:[%s3112_s6 + $0x78] sm:$0xff]  ;;  %v3167_v13 = vld [vmem:[#allocation27_spill] sm:$0xff] }
 0x72a   :  { %v1408_v17 = vadd.f32 %v1404_v63, %v2527_v42  ;;  %v1361_v18 = vpop.f32.mrb[43].mxu0  ;;  %v1402_v62 = vpop.f32.mrb[43].mxu1  ;;  %v1410_v25 = vadd.f32 %v1406_v6, %v2533_v50  ;;  %v2108_v63 = vmov 0.0   ;;  %v1608_v6 = vld [vmem:[%s3112_s6 + $0x70] sm:$0xff]  ;;  %v3168_v15 = vld [vmem:[#allocation28_spill] sm:$0xff] }
 0x72b   :  { %v1409_v22 = vadd.f32 %v1405_v12, %v2529_v8  ;;  %v1411_v26 = vadd.f32 %v1407_v14, %v2535_v53  ;;  %v1873_v47 = vpack.c.bf16 %v1609_v38, %v1608_v6  ;;  %v3169_v62 = vld [vmem:[#allocation29_spill] sm:$0xff] }
 0x72c   :  { %v1783_v23 = vmul.f32 -1.442695, %v1408_v17  ;;  %v1785_v27 = vmul.f32 -1.442695, %v1410_v25 }
 0x72d   :  { %v1784_v24 = vmul.f32 -1.442695, %v1409_v22 }
 0x72e   :  { %2041 = vpow2.f32 %v1783_v23  ;;  %v3170_v23 = vld [vmem:[#allocation30_spill] sm:$0xff] }
 0x72f   :  { %2043 = vpow2.f32 %v1784_v24 }
 0x730   :  { %2045 = vtanh.f32 %v1411_v26 }
 0x731   :  { %2047 = vpow2.f32 %v1785_v27 }
 0x738   :  { %v2042_v28 = vpop.eup %2041 }
 0x739   :  { %v1421_v30 = vadd.f32 1.0, %v2042_v28  ;;  %v2044_v31 = vpop.eup %2043 }
 0x73a   :  { %v1422_v32 = vadd.f32 1.0, %v2044_v31  ;;  %v2046_v33 = vpop.eup %2045 }
 0x73b   :  { %2049 = vrcp.f32 %v1421_v30  ;;  %v2048_v34 = vpop.eup %2047 }
 0x73c   :  { %2051 = vrcp.f32 %v1422_v32  ;;  %v1423_v57 = vadd.f32 1.0, %v2048_v34 }
 0x73e   :  { %2053 = vrcp.f32 %v1423_v57 }
 0x745   :  { %v2050_v35 = vpop.eup %2049 }
 0x746   :  { %v1432_v36 = vmul.f32 %v2050_v35, %v2046_v33  ;;  %v2052_v37 = vpop.eup %2051 }
 0x747   :  { %v1431_v20 = vmul.f32 %v2052_v37, %v2971_v10 }
 0x748   :  { %v2054_v39 = vpop.eup %2053 }
 0x749   :  { %v1433_v58 = vadd.f32 %v1432_v36, %v1431_v20 }
 0x74b   :  { %2055 = vtanh.f32 %v1433_v58  ;;  %v3021_v59 = vsel %vm1443_vm1, %v1433_v58, %v2971_v10  ;;  %v1861_v10 = vpack.c.bf16 %v1601_v1, %v1600_v46 }
 0x755   :  { %v2056_v60 = vpop.eup %2055 }
 0x756   :  { %v1435_v54 = vmul.f32 %v2056_v60, %v2054_v39 }
 0x758   :  { %v3024_v55 = vsel %vm1443_vm1, %v1435_v54, %v2974_v48  ;;  %v1604_v48 = vld [vmem:[%s3112_s6 + $0x50] sm:$0xff]  ;;  %v1574_v54 = vpop.permute.xlu1 %1573 }
 0x759   :  { %v1453_v49 = vpack.c.bf16 %v3024_v55, %v3024_v55  ;;  %v1867_v19 = vpack.c.bf16 %v1605_v51, %v1604_v48  ;;  %vm1575_vm3 = vcmp.eq.s32.totalorder %v1574_v54, 1 }
 0x75b   :  { %1487 = vmatmul.mubr.bf16.vlgmr.msra.gmra.mrb[44].mxu0 %v1453_v49  ;;  %1528 = vmatmul.mubr.bf16.vlgmr.msra.gmra.mrb[44].mxu1 %v1453_v49 }
 0x75c   :  { %1853 = vmatpush3.bf16.msra.mxu0 %v1852_v40  ;;  %1848 = vmatprep.mubr.msk.f32.mxu0 %vm2107_vm2, %v2108_v63  ;;  %v1591_v40 = vpop.permute.xlu0 %1590 }
 0x75d   :  { %1854 = vmatprep.subr.bf16.mxu0 %v3162_v52  ;;  %vm1592_vm4 = vcmp.eq.s32.totalorder %v1591_v40, 1 }
 0x760   :  { %1856 = vmatpush3.bf16.msra.mxu0 %v1855_v44 }
 0x761   :  { %1857 = vmatprep.subr.bf16.mxu0 %v3162_v52 }
 0x764   :  { %1859 = vmatpush3.bf16.msra.mxu0 %v1858_v7 }
 0x765   :  { %1860 = vmatprep.subr.bf16.mxu0 %v3162_v52 }
 0x768   :  { %1862 = vmatpush3.bf16.msra.mxu0 %v1861_v10 }
 0x769   :  { %1863 = vmatprep.subr.bf16.mxu0 %v3162_v52 }
 0x76c   :  { %1865 = vmatpush3.bf16.msra.mxu0 %v1864_v29 }
 0x76d   :  { %1866 = vmatprep.subr.bf16.mxu0 %v3162_v52 }
 0x770   :  { %1868 = vmatpush3.bf16.msra.mxu0 %v1867_v19 }
 0x771   :  { %1869 = vmatprep.subr.bf16.mxu0 %v3162_v52 }
 0x774   :  { %1871 = vmatpush3.bf16.msra.mxu0 %v1870_v3 }
 0x775   :  { %1872 = vmatprep.subr.bf16.mxu0 %v3162_v52 }
 0x778   :  { %1874 = vmatpush3.bf16.msra.mxu0 %v1873_v47 }
 0x82e   :  { %v1488_v2 = vpop.f32.mrb[44].mxu0  ;;  %v1529_v12 = vpop.f32.mrb[44].mxu1 }
 0x82f   :  { %v1536_v14 = vadd.f32 %v1488_v2, %v3167_v13  ;;  %v1538_v16 = vadd.f32 %v1529_v12, %v3168_v15  ;;  %v1490_v17 = vpop.f32.mrb[45].mxu0  ;;  %v1531_v18 = vpop.f32.mrb[45].mxu1 }
 0x830   :  { %v1537_v22 = vadd.f32 %v1490_v17, %v3169_v62  ;;  %v1539_v24 = vadd.f32 %v1531_v18, %v3170_v23  ;;  %v1492_v25 = vpop.f32.mrb[46].mxu0  ;;  %v1533_v26 = vpop.f32.mrb[46].mxu1 }
 0x831   :  { %v1540_v27 = vadd.f32 %v1536_v14, %v2527_v42  ;;  %v1493_v28 = vpop.f32.mrb[47].mxu0  ;;  %v1534_v30 = vpop.f32.mrb[47].mxu1  ;;  %v1542_v33 = vadd.f32 %v1538_v16, %v2533_v50 }
 0x832   :  { %v1541_v52 = vadd.f32 %v1537_v22, %v2529_v8  ;;  %v1543_v34 = vadd.f32 %v1539_v24, %v2535_v53 }
 0x833   :  { %v1787_v31 = vmul.f32 -1.442695, %v1540_v27  ;;  %v1789_v35 = vmul.f32 -1.442695, %v1542_v33 }
 0x834   :  { %v1788_v32 = vmul.f32 -1.442695, %v1541_v52 }
 0x835   :  { %2057 = vpow2.f32 %v1787_v31 }
 0x836   :  { %2059 = vpow2.f32 %v1788_v32 }
 0x837   :  { %2061 = vtanh.f32 %v1543_v34 }
 0x838   :  { %2063 = vpow2.f32 %v1789_v35 }
 0x83f   :  { %v2058_v36 = vpop.eup %2057 }
 0x840   :  { %v1553_v37 = vadd.f32 1.0, %v2058_v36  ;;  %v2060_v57 = vpop.eup %2059 }
 0x841   :  { %v1554_v42 = vadd.f32 1.0, %v2060_v57  ;;  %v2062_v20 = vpop.eup %2061 }
 0x842   :  { %2065 = vrcp.f32 %v1553_v37  ;;  %v2064_v21 = vpop.eup %2063 }
 0x843   :  { %2067 = vrcp.f32 %v1554_v42  ;;  %v1555_v60 = vadd.f32 1.0, %v2064_v21 }
 0x845   :  { %2069 = vrcp.f32 %v1555_v60 }
 0x84c   :  { %v2066_v8 = vpop.eup %2065 }
 0x84d   :  { %v1564_v58 = vmul.f32 %v2066_v8, %v2062_v20  ;;  %v2068_v39 = vpop.eup %2067 }
 0x84e   :  { %v1563_v50 = vmul.f32 %v2068_v39, %v3021_v59 }
 0x84f   :  { %v2070_v5 = vpop.eup %2069 }
 0x850   :  { %v1565_v49 = vadd.f32 %v1564_v58, %v1563_v50 }
 0x852   :  { %2071 = vtanh.f32 %v1565_v49  ;;  %v1577_v53 = vsel %vm1575_vm3, %v1565_v49, %v3021_v59  ;;  %v1791_v59 = vld [vmem:[%s3115_s7] ss:$0 sm:$0xff] }
 0x853   :  { %1584 = vst [vmem:[%s3113_s10] sm:$0xff] %v1577_v53 }
 0x85c   :  { %v2072_v4 = vpop.eup %2071 }
 0x85d   :  { %v1567_v41 = vmul.f32 %v2072_v4, %v2070_v5 }
 0x85f   :  { %v1576_v43 = vsel %vm1575_vm3, %v1567_v41, %v3024_v55 }
 0x860   :  { %1583 = vst [vmem:[%s3114_s9] sm:$0xff] %v1576_v43  ;;  %1849 = vmatmul.mubr.msk.f32.vlgmr.msra.gmra.mrb[48].mxu0 %vm1592_vm4, %v1576_v43 }
 0x933   :  { %v1683_v44 = vpop.f32.mrb[48].mxu0 }
 0x934   :  { %v1684_v45 = vadd.f32 %v1791_v59, %v1683_v44  ;;  %v1850_v61 = vpop.f32.mrb[49].mxu0 }
 0x936   :  { %1687 = vst [vmem:[%s3116_s8] sm:$0xff] %v1684_v45 }

</bundles_post_ra>
